<compile_context>
chip_gen: v6e
topology: v6e:2x2x1
jax: 0.10.0
libtpu: 0.0.40
codegen_flags: <defaults>
</compile_context>

<pallas_src>
import functools

import numpy as np

import jax
import jax.numpy as jnp
from jax import lax
from jax.experimental import pallas as pl
from jax.experimental.pallas import tpu as pltpu


def _distmax_kernel(bmin_ref, bmax_ref,                    # scalar prefetch (SMEM)
                    xs_i_ref, xs_jT_ref, bi_ref, bj_ref,   # blocked inputs
                    b_ref,                                 # SMEM bias (1,)
                    out_ref, mask_ref,                     # outputs
                    *, tile, slab, n_pos, emb_dim, train):
    i = pl.program_id(0)
    j = pl.program_id(1)

    # Conservative tile skip: if the batch-id ranges of the i-block and the
    # j-block are disjoint there can be no equal pair -> tile fully masked.
    overlap = jnp.logical_and(bmax_ref[i] >= bmin_ref[j],
                              bmax_ref[j] >= bmin_ref[i])

    @pl.when(jnp.logical_not(overlap))
    def _():
        out_ref[...] = jnp.zeros_like(out_ref)
        mask_ref[...] = jnp.zeros_like(mask_ref)

    @pl.when(overlap)
    def _():
        n_slabs = tile // slab
        bias = b_ref[0]
        bj_row = bj_ref[...]                                     # (1, tile) int32

        # Hoisted local (row - col) offsets; per slab the diagonal test is a
        # single scalar add + vector compare.
        sc_diff = (lax.broadcasted_iota(jnp.int32, (slab, tile), 0)
                   - lax.broadcasted_iota(jnp.int32, (slab, tile), 1))
        diag_base = (i - j) * tile                               # scalar

        def slab_body(s, carry):
            row0 = pl.multiple_of(s * slab, slab)
            xs_i_slab = xs_i_ref[pl.ds(row0, slab), :]           # (slab, D)
            bi_slab = bi_ref[pl.ds(row0, slab), :]               # (slab, 1)

            # Mask: same graph id and off-diagonal (global row != global col).
            same_graph = bi_slab == bj_row                       # (slab, tile)
            notdiag = (sc_diff + (diag_base + row0)) != 0
            maskf = jnp.logical_and(same_graph, notdiag).astype(jnp.float32)

            # d_pred accumulated over emb_dim in a register-resident
            # (slab, tile) f32 accumulator.  xs is prescaled by w and columns
            # are sign-sorted, so each d costs one max/min + one add.
            acc = jnp.zeros((slab, tile), jnp.float32)
            for d in range(n_pos):                               # w[d] >= 0
                a_col = xs_i_slab[:, d:d + 1]                    # (slab, 1)
                b_row = xs_jT_ref[d:d + 1, :]                    # (1, tile)
                acc = acc + jnp.maximum(a_col, b_row)
            for d in range(n_pos, emb_dim):                      # w[d] < 0
                a_col = xs_i_slab[:, d:d + 1]
                b_row = xs_jT_ref[d:d + 1, :]
                acc = acc + jnp.minimum(a_col, b_row)

            res = (acc + bias) * maskf
            if not train:                                        # eval: ReLU
                res = jnp.maximum(res, 0.0)

            out_ref[pl.ds(row0, slab), :] = res
            mask_ref[pl.ds(row0, slab), :] = maskf
            return carry

        lax.fori_loop(0, n_slabs, slab_body, 0)


def dist_max(xs, batch, weight, bias, *, train=False,
             compute_dtype=jnp.float32):
    """xs: (N, D) float, batch: (N,) int, weight: (1, D), bias: (1,).

    Returns (mask_d_pred (N,N) f32, mask (N,N) f32, count scalar f32).
    The weight's sign pattern is inspected eagerly (compile-time static).
    """
    N, D = xs.shape

    # Square tiles: 128 for small N (keeps >=2 grid tiles sooner, feeds both
    # v7x TensorCores), 256 (lane-dense stores) otherwise.
    TS = 128 if N <= 256 else 256
    SLAB = 32                                     # 32 x TS f32 acc <= 8 vregs
    N_pad = ((N + TS - 1) // TS) * TS
    G = N_pad // TS

    # ---- fold the Linear weight into xs (sign-split prescale) --------------
    w_flat = jnp.asarray(weight, jnp.float32).reshape(-1)        # (D,)
    w_np = np.asarray(w_flat)                     # concrete values for the split
    order = np.concatenate([np.nonzero(w_np >= 0)[0],
                            np.nonzero(w_np < 0)[0]]).astype(np.int32)
    n_pos = int(np.sum(w_np >= 0))                # static split point

    xs32 = xs.astype(jnp.float32)
    xs_scaled = xs32[:, order] * w_flat[order][None, :]          # (N, D)
    xs_scaled = xs_scaled.astype(compute_dtype)
    if N_pad != N:
        xs_scaled = jnp.pad(xs_scaled, ((0, N_pad - N), (0, 0)))
    xs_T = xs_scaled.T                            # (D, N_pad): j on lanes

    # ---- batch ids / tile-skip metadata ------------------------------------
    batch_i32 = batch.astype(jnp.int32)
    # Distinct negative sentinel ids for padding rows: never equal to a real
    # id nor to each other -> padded region of the mask is exactly zero.
    pad_ids = -(jnp.arange(N_pad, dtype=jnp.int32) + 1)
    batch_pad = jnp.where(jnp.arange(N_pad) < N,
                          jnp.pad(batch_i32, (0, N_pad - N)), pad_ids)
    batch_col = batch_pad.reshape(N_pad, 1)
    batch_row = batch_pad.reshape(1, N_pad)

    bblk = batch_pad.reshape(G, TS)
    bmin = jnp.min(bblk, axis=1).astype(jnp.int32)
    bmax = jnp.max(bblk, axis=1).astype(jnp.int32)

    b1 = jnp.asarray(bias, jnp.float32).reshape(1)               # SMEM (1,)

    kernel = functools.partial(_distmax_kernel, tile=TS, slab=SLAB,
                               n_pos=n_pos, emb_dim=D, train=train)

    itemsize = jnp.dtype(compute_dtype).itemsize
    cost = pl.CostEstimate(
        flops=2 * N_pad * N_pad * D + 6 * N_pad * N_pad,
        transcendentals=0,
        bytes_accessed=8 * N_pad * N_pad + 2 * G * N_pad * D * itemsize)

    out_p, mask_p = pl.pallas_call(
        kernel,
        out_shape=(
            jax.ShapeDtypeStruct((N_pad, N_pad), jnp.float32),
            jax.ShapeDtypeStruct((N_pad, N_pad), jnp.float32),
        ),
        grid_spec=pltpu.PrefetchScalarGridSpec(
            num_scalar_prefetch=2,
            grid=(G, G),
            in_specs=[
                pl.BlockSpec((TS, D), lambda i, j, bmin, bmax: (i, 0)),  # xs rows (i)
                pl.BlockSpec((D, TS), lambda i, j, bmin, bmax: (0, j)),  # xs^T cols (j)
                pl.BlockSpec((TS, 1), lambda i, j, bmin, bmax: (i, 0)),  # batch ids (i)
                pl.BlockSpec((1, TS), lambda i, j, bmin, bmax: (0, j)),  # batch ids (j)
                pl.BlockSpec(memory_space=pltpu.MemorySpace.SMEM),       # bias (1,)
            ],
            out_specs=[
                pl.BlockSpec((TS, TS), lambda i, j, bmin, bmax: (i, j)),
                pl.BlockSpec((TS, TS), lambda i, j, bmin, bmax: (i, j)),
            ],
        ),
        compiler_params=pltpu.CompilerParams(
            dimension_semantics=("parallel", "parallel")),
        cost_estimate=cost,
    )(bmin, bmax, xs_scaled, xs_T, batch_col, batch_row, b1)

    out = out_p[:N, :N]
    mask = mask_p[:N, :N]

    # count = sum(mask) = sum_g n_g^2 - N, computed in O(N) (no N^2 re-read).
    # NOTE: assumes graph ids lie in [0, N) (true for contiguous PyG batches).
    n_per_graph = jax.ops.segment_sum(jnp.ones((N,), jnp.float32),
                                      batch_i32, num_segments=N)
    count = jnp.sum(n_per_graph * n_per_graph) - jnp.float32(N)

    return out, mask, count


def _reference(xs, batch, weight, bias, train=False):
    """Pure-JAX reference mirroring the PyTorch forward."""
    m = jnp.maximum(xs[None, :, :], xs[:, None, :])                  # (N, N, D)
    d_pred = jnp.squeeze(m @ weight.reshape(-1, 1) + bias, axis=-1)  # (N, N)
    eye = jnp.eye(batch.shape[0], dtype=jnp.float32)
    mask = (batch[:, None] == batch[None, :]).astype(jnp.float32) * (1.0 - eye)
    count = jnp.sum(mask)
    mdp = d_pred * mask
    if not train:
        mdp = jax.nn.relu(mdp)
    return mdp, mask, count


if __name__ == "__main__":
    key = jax.random.PRNGKey(0)
    N, D = 8, 32                                  # seq=8 nodes, emb_dim=32

    k_xs, _ = jax.random.split(key)
    xs = jax.random.normal(k_xs, (N, D), dtype=jnp.float32)
    batch = jnp.array([0, 0, 0, 1, 1, 2, 2, 2], dtype=jnp.int32)

    # Deterministic Linear(emb_dim, 1) parameters (synthetic, not a checkpoint).
    weight = ((jnp.arange(D, dtype=jnp.float32) / D) - 0.5).reshape(1, D) * 0.3
    bias = jnp.array([0.1], dtype=jnp.float32)

    out, mask, count = dist_max(xs, batch, weight, bias, train=False)
    jax.block_until_ready((out, mask, count))

    ref_out, ref_mask, ref_count = _reference(xs, batch, weight, bias, train=False)
    assert jnp.allclose(out, ref_out, atol=1e-5, rtol=1e-5)
    assert jnp.allclose(mask, ref_mask)
    assert jnp.allclose(count, ref_count)

    print("KERNEL_OK")
</pallas_src>

<mosaic_0001>
module attributes {stable_mosaic.version = 11 : i64} {
  func.func @_distmax_kernel(%arg0: i32, %arg1: i32, %arg2: memref<1xi32, #tpu.memory_space<smem>>, %arg3: memref<1xi32, #tpu.memory_space<smem>>, %arg4: memref<128x32xf32, #tpu.memory_space<vmem>>, %arg5: memref<32x128xf32, #tpu.memory_space<vmem>>, %arg6: memref<128x1xi32, #tpu.memory_space<vmem>>, %arg7: memref<1x128xi32, #tpu.memory_space<vmem>>, %arg8: memref<1xf32, #tpu.memory_space<smem>>, %arg9: memref<128x128xf32, #tpu.memory_space<vmem>>, %arg10: memref<128x128xf32, #tpu.memory_space<vmem>>) attributes {dimension_semantics = [#tpu.dimension_semantics<parallel>, #tpu.dimension_semantics<parallel>], iteration_bounds = array<i64: 1, 1>, scalar_prefetch = 2 : i64, scratch_operands = 0 : i64, tpu.core_type = #tpu.core_type<tc>, window_params = [{transform_indices = @transform_0, window_bounds = array<i64: 128, 32>}, {transform_indices = @transform_1, window_bounds = array<i64: 32, 128>}, {transform_indices = @transform_2, window_bounds = array<i64: 128, 1>}, {transform_indices = @transform_3, window_bounds = array<i64: 1, 128>}, {transform_indices = @transform_4, window_bounds = array<i64: 1>}, {transform_indices = @transform_5, window_bounds = array<i64: 128, 128>}, {transform_indices = @transform_6, window_bounds = array<i64: 128, 128>}]} {
    %0 = arith.index_cast %arg0 : i32 to index
    %1 = memref.load %arg3[%0] : memref<1xi32, #tpu.memory_space<smem>>
    %2 = arith.index_cast %arg1 : i32 to index
    %3 = memref.load %arg2[%2] : memref<1xi32, #tpu.memory_space<smem>>
    %4 = arith.cmpi sge, %1, %3 : i32
    %5 = arith.index_cast %arg1 : i32 to index
    %6 = memref.load %arg3[%5] : memref<1xi32, #tpu.memory_space<smem>>
    %7 = arith.index_cast %arg0 : i32 to index
    %8 = memref.load %arg2[%7] : memref<1xi32, #tpu.memory_space<smem>>
    %9 = arith.cmpi sge, %6, %8 : i32
    %10 = arith.andi %4, %9 : i1
    %true = arith.constant true
    %11 = arith.xori %10, %true : i1
    %12 = arith.extui %11 : i1 to i32
    %c0_i32 = arith.constant 0 : i32
    %13 = arith.cmpi ne, %12, %c0_i32 : i32
    scf.if %13 {
      %cst = arith.constant 0.000000e+00 : f32
      %16 = vector.broadcast %cst : f32 to vector<128x128xf32>
      %c0 = arith.constant 0 : index
      %c0_1 = arith.constant 0 : index
      %17 = vector.load %arg9[%c0, %c0_1] : memref<128x128xf32, #tpu.memory_space<vmem>>, vector<128x128xf32>
      tpu.vector_store %arg9[%c0, %c0_1], %16 {strides = array<i32>} : memref<128x128xf32, #tpu.memory_space<vmem>>, vector<128x128xf32>,
      %cst_2 = arith.constant 0.000000e+00 : f32
      %18 = vector.broadcast %cst_2 : f32 to vector<128x128xf32>
      %c0_3 = arith.constant 0 : index
      %c0_4 = arith.constant 0 : index
      %19 = vector.load %arg10[%c0_3, %c0_4] : memref<128x128xf32, #tpu.memory_space<vmem>>, vector<128x128xf32>
      tpu.vector_store %arg10[%c0_3, %c0_4], %18 {strides = array<i32>} : memref<128x128xf32, #tpu.memory_space<vmem>>, vector<128x128xf32>,
    } else {
    }
    %14 = arith.extui %10 : i1 to i32
    %c0_i32_0 = arith.constant 0 : i32
    %15 = arith.cmpi ne, %14, %c0_i32_0 : i32
    scf.if %15 {
      %c0 = arith.constant 0 : index
      %16 = memref.load %arg8[%c0] : memref<1xf32, #tpu.memory_space<smem>>
      %c0_1 = arith.constant 0 : index
      %c0_2 = arith.constant 0 : index
      %17 = vector.load %arg7[%c0_1, %c0_2] : memref<1x128xi32, #tpu.memory_space<vmem>>, vector<1x128xi32>
      %18 = tpu.iota {dimensions = array<i32: 0>} : vector<32x128xi32>
      %19 = tpu.iota {dimensions = array<i32: 1>} : vector<32x128xi32>
      %20 = arith.subi %18, %19 : vector<32x128xi32>
      %21 = arith.subi %arg0, %arg1 : i32
      %c128_i32 = arith.constant 128 : i32
      %22 = arith.muli %21, %c128_i32 : i32
      %c0_i32_3 = arith.constant 0 : i32
      %c4_i32 = arith.constant 4 : i32
      %23 = arith.addi %c0_i32_3, %c4_i32 : i32
      %c1_i32 = arith.constant 1 : i32
      scf.for %arg11 = %c0_i32_3 to %23 step %c1_i32  : i32 {
        %c32_i32 = arith.constant 32 : i32
        %24 = arith.muli %arg11, %c32_i32 : i32
        %25 = tpu.assume_multiple %24, 32 : i32
        %26 = arith.index_cast %25 : i32 to index
        %c0_5 = arith.constant 0 : index
        %27 = vector.load %arg4[%26, %c0_5] : memref<128x32xf32, #tpu.memory_space<vmem>>, vector<32x32xf32>
        %28 = arith.index_cast %25 : i32 to index
        %c0_6 = arith.constant 0 : index
        %29 = vector.load %arg6[%28, %c0_6] : memref<128x1xi32, #tpu.memory_space<vmem>>, vector<32x1xi32>
        %30 = vector.broadcast %29 : vector<32x1xi32> to vector<32x128xi32>
        %31 = vector.broadcast %17 : vector<1x128xi32> to vector<32x128xi32>
        %32 = arith.cmpi eq, %30, %31 : vector<32x128xi32>
        %33 = arith.addi %22, %25 : i32
        %34 = vector.broadcast %33 : i32 to vector<32x128xi32>
        %35 = arith.addi %20, %34 : vector<32x128xi32>
        %c0_i32_7 = arith.constant 0 : i32
        %36 = vector.broadcast %c0_i32_7 : i32 to vector<32x128xi32>
        %37 = arith.cmpi ne, %35, %36 : vector<32x128xi32>
        %38 = arith.andi %32, %37 : vector<32x128xi1>
        %39 = arith.extui %38 : vector<32x128xi1> to vector<32x128xi32>
        %40 = arith.sitofp %39 : vector<32x128xi32> to vector<32x128xf32>
        %cst = arith.constant 0.000000e+00 : f32
        %41 = vector.broadcast %cst : f32 to vector<32x128xf32>
        %42 = vector.extract_strided_slice %27 {offsets = [0, 0], sizes = [32, 1], strides = [1, 1]} : vector<32x32xf32> to vector<32x1xf32>
        %c0_8 = arith.constant 0 : index
        %c0_9 = arith.constant 0 : index
        %43 = vector.load %arg5[%c0_8, %c0_9] : memref<32x128xf32, #tpu.memory_space<vmem>>, vector<1x128xf32>
        %44 = vector.broadcast %42 : vector<32x1xf32> to vector<32x128xf32>
        %45 = vector.broadcast %43 : vector<1x128xf32> to vector<32x128xf32>
        %46 = arith.maximumf %44, %45 : vector<32x128xf32>
        %47 = arith.addf %41, %46 : vector<32x128xf32>
        %48 = vector.extract_strided_slice %27 {offsets = [0, 1], sizes = [32, 1], strides = [1, 1]} : vector<32x32xf32> to vector<32x1xf32>
        %c1 = arith.constant 1 : index
        %c0_10 = arith.constant 0 : index
        %49 = vector.load %arg5[%c1, %c0_10] : memref<32x128xf32, #tpu.memory_space<vmem>>, vector<1x128xf32>
        %50 = vector.broadcast %48 : vector<32x1xf32> to vector<32x128xf32>
        %51 = vector.broadcast %49 : vector<1x128xf32> to vector<32x128xf32>
        %52 = arith.maximumf %50, %51 : vector<32x128xf32>
        %53 = arith.addf %47, %52 : vector<32x128xf32>
        %54 = vector.extract_strided_slice %27 {offsets = [0, 2], sizes = [32, 1], strides = [1, 1]} : vector<32x32xf32> to vector<32x1xf32>
        %c2 = arith.constant 2 : index
        %c0_11 = arith.constant 0 : index
        %55 = vector.load %arg5[%c2, %c0_11] : memref<32x128xf32, #tpu.memory_space<vmem>>, vector<1x128xf32>
        %56 = vector.broadcast %54 : vector<32x1xf32> to vector<32x128xf32>
        %57 = vector.broadcast %55 : vector<1x128xf32> to vector<32x128xf32>
        %58 = arith.maximumf %56, %57 : vector<32x128xf32>
        %59 = arith.addf %53, %58 : vector<32x128xf32>
        %60 = vector.extract_strided_slice %27 {offsets = [0, 3], sizes = [32, 1], strides = [1, 1]} : vector<32x32xf32> to vector<32x1xf32>
        %c3 = arith.constant 3 : index
        %c0_12 = arith.constant 0 : index
        %61 = vector.load %arg5[%c3, %c0_12] : memref<32x128xf32, #tpu.memory_space<vmem>>, vector<1x128xf32>
        %62 = vector.broadcast %60 : vector<32x1xf32> to vector<32x128xf32>
        %63 = vector.broadcast %61 : vector<1x128xf32> to vector<32x128xf32>
        %64 = arith.maximumf %62, %63 : vector<32x128xf32>
        %65 = arith.addf %59, %64 : vector<32x128xf32>
        %66 = vector.extract_strided_slice %27 {offsets = [0, 4], sizes = [32, 1], strides = [1, 1]} : vector<32x32xf32> to vector<32x1xf32>
        %c4 = arith.constant 4 : index
        %c0_13 = arith.constant 0 : index
        %67 = vector.load %arg5[%c4, %c0_13] : memref<32x128xf32, #tpu.memory_space<vmem>>, vector<1x128xf32>
        %68 = vector.broadcast %66 : vector<32x1xf32> to vector<32x128xf32>
        %69 = vector.broadcast %67 : vector<1x128xf32> to vector<32x128xf32>
        %70 = arith.maximumf %68, %69 : vector<32x128xf32>
        %71 = arith.addf %65, %70 : vector<32x128xf32>
        %72 = vector.extract_strided_slice %27 {offsets = [0, 5], sizes = [32, 1], strides = [1, 1]} : vector<32x32xf32> to vector<32x1xf32>
        %c5 = arith.constant 5 : index
        %c0_14 = arith.constant 0 : index
        %73 = vector.load %arg5[%c5, %c0_14] : memref<32x128xf32, #tpu.memory_space<vmem>>, vector<1x128xf32>
        %74 = vector.broadcast %72 : vector<32x1xf32> to vector<32x128xf32>
        %75 = vector.broadcast %73 : vector<1x128xf32> to vector<32x128xf32>
        %76 = arith.maximumf %74, %75 : vector<32x128xf32>
        %77 = arith.addf %71, %76 : vector<32x128xf32>
        %78 = vector.extract_strided_slice %27 {offsets = [0, 6], sizes = [32, 1], strides = [1, 1]} : vector<32x32xf32> to vector<32x1xf32>
        %c6 = arith.constant 6 : index
        %c0_15 = arith.constant 0 : index
        %79 = vector.load %arg5[%c6, %c0_15] : memref<32x128xf32, #tpu.memory_space<vmem>>, vector<1x128xf32>
        %80 = vector.broadcast %78 : vector<32x1xf32> to vector<32x128xf32>
        %81 = vector.broadcast %79 : vector<1x128xf32> to vector<32x128xf32>
        %82 = arith.maximumf %80, %81 : vector<32x128xf32>
        %83 = arith.addf %77, %82 : vector<32x128xf32>
        %84 = vector.extract_strided_slice %27 {offsets = [0, 7], sizes = [32, 1], strides = [1, 1]} : vector<32x32xf32> to vector<32x1xf32>
        %c7 = arith.constant 7 : index
        %c0_16 = arith.constant 0 : index
        %85 = vector.load %arg5[%c7, %c0_16] : memref<32x128xf32, #tpu.memory_space<vmem>>, vector<1x128xf32>
        %86 = vector.broadcast %84 : vector<32x1xf32> to vector<32x128xf32>
        %87 = vector.broadcast %85 : vector<1x128xf32> to vector<32x128xf32>
        %88 = arith.maximumf %86, %87 : vector<32x128xf32>
        %89 = arith.addf %83, %88 : vector<32x128xf32>
        %90 = vector.extract_strided_slice %27 {offsets = [0, 8], sizes = [32, 1], strides = [1, 1]} : vector<32x32xf32> to vector<32x1xf32>
        %c8 = arith.constant 8 : index
        %c0_17 = arith.constant 0 : index
        %91 = vector.load %arg5[%c8, %c0_17] : memref<32x128xf32, #tpu.memory_space<vmem>>, vector<1x128xf32>
        %92 = vector.broadcast %90 : vector<32x1xf32> to vector<32x128xf32>
        %93 = vector.broadcast %91 : vector<1x128xf32> to vector<32x128xf32>
        %94 = arith.maximumf %92, %93 : vector<32x128xf32>
        %95 = arith.addf %89, %94 : vector<32x128xf32>
        %96 = vector.extract_strided_slice %27 {offsets = [0, 9], sizes = [32, 1], strides = [1, 1]} : vector<32x32xf32> to vector<32x1xf32>
        %c9 = arith.constant 9 : index
        %c0_18 = arith.constant 0 : index
        %97 = vector.load %arg5[%c9, %c0_18] : memref<32x128xf32, #tpu.memory_space<vmem>>, vector<1x128xf32>
        %98 = vector.broadcast %96 : vector<32x1xf32> to vector<32x128xf32>
        %99 = vector.broadcast %97 : vector<1x128xf32> to vector<32x128xf32>
        %100 = arith.maximumf %98, %99 : vector<32x128xf32>
        %101 = arith.addf %95, %100 : vector<32x128xf32>
        %102 = vector.extract_strided_slice %27 {offsets = [0, 10], sizes = [32, 1], strides = [1, 1]} : vector<32x32xf32> to vector<32x1xf32>
        %c10 = arith.constant 10 : index
        %c0_19 = arith.constant 0 : index
        %103 = vector.load %arg5[%c10, %c0_19] : memref<32x128xf32, #tpu.memory_space<vmem>>, vector<1x128xf32>
        %104 = vector.broadcast %102 : vector<32x1xf32> to vector<32x128xf32>
        %105 = vector.broadcast %103 : vector<1x128xf32> to vector<32x128xf32>
        %106 = arith.maximumf %104, %105 : vector<32x128xf32>
        %107 = arith.addf %101, %106 : vector<32x128xf32>
        %108 = vector.extract_strided_slice %27 {offsets = [0, 11], sizes = [32, 1], strides = [1, 1]} : vector<32x32xf32> to vector<32x1xf32>
        %c11 = arith.constant 11 : index
        %c0_20 = arith.constant 0 : index
        %109 = vector.load %arg5[%c11, %c0_20] : memref<32x128xf32, #tpu.memory_space<vmem>>, vector<1x128xf32>
        %110 = vector.broadcast %108 : vector<32x1xf32> to vector<32x128xf32>
        %111 = vector.broadcast %109 : vector<1x128xf32> to vector<32x128xf32>
        %112 = arith.maximumf %110, %111 : vector<32x128xf32>
        %113 = arith.addf %107, %112 : vector<32x128xf32>
        %114 = vector.extract_strided_slice %27 {offsets = [0, 12], sizes = [32, 1], strides = [1, 1]} : vector<32x32xf32> to vector<32x1xf32>
        %c12 = arith.constant 12 : index
        %c0_21 = arith.constant 0 : index
        %115 = vector.load %arg5[%c12, %c0_21] : memref<32x128xf32, #tpu.memory_space<vmem>>, vector<1x128xf32>
        %116 = vector.broadcast %114 : vector<32x1xf32> to vector<32x128xf32>
        %117 = vector.broadcast %115 : vector<1x128xf32> to vector<32x128xf32>
        %118 = arith.maximumf %116, %117 : vector<32x128xf32>
        %119 = arith.addf %113, %118 : vector<32x128xf32>
        %120 = vector.extract_strided_slice %27 {offsets = [0, 13], sizes = [32, 1], strides = [1, 1]} : vector<32x32xf32> to vector<32x1xf32>
        %c13 = arith.constant 13 : index
        %c0_22 = arith.constant 0 : index
        %121 = vector.load %arg5[%c13, %c0_22] : memref<32x128xf32, #tpu.memory_space<vmem>>, vector<1x128xf32>
        %122 = vector.broadcast %120 : vector<32x1xf32> to vector<32x128xf32>
        %123 = vector.broadcast %121 : vector<1x128xf32> to vector<32x128xf32>
        %124 = arith.maximumf %122, %123 : vector<32x128xf32>
        %125 = arith.addf %119, %124 : vector<32x128xf32>
        %126 = vector.extract_strided_slice %27 {offsets = [0, 14], sizes = [32, 1], strides = [1, 1]} : vector<32x32xf32> to vector<32x1xf32>
        %c14 = arith.constant 14 : index
        %c0_23 = arith.constant 0 : index
        %127 = vector.load %arg5[%c14, %c0_23] : memref<32x128xf32, #tpu.memory_space<vmem>>, vector<1x128xf32>
        %128 = vector.broadcast %126 : vector<32x1xf32> to vector<32x128xf32>
        %129 = vector.broadcast %127 : vector<1x128xf32> to vector<32x128xf32>
        %130 = arith.maximumf %128, %129 : vector<32x128xf32>
        %131 = arith.addf %125, %130 : vector<32x128xf32>
        %132 = vector.extract_strided_slice %27 {offsets = [0, 15], sizes = [32, 1], strides = [1, 1]} : vector<32x32xf32> to vector<32x1xf32>
        %c15 = arith.constant 15 : index
        %c0_24 = arith.constant 0 : index
        %133 = vector.load %arg5[%c15, %c0_24] : memref<32x128xf32, #tpu.memory_space<vmem>>, vector<1x128xf32>
        %134 = vector.broadcast %132 : vector<32x1xf32> to vector<32x128xf32>
        %135 = vector.broadcast %133 : vector<1x128xf32> to vector<32x128xf32>
        %136 = arith.maximumf %134, %135 : vector<32x128xf32>
        %137 = arith.addf %131, %136 : vector<32x128xf32>
        %138 = vector.extract_strided_slice %27 {offsets = [0, 16], sizes = [32, 1], strides = [1, 1]} : vector<32x32xf32> to vector<32x1xf32>
        %c16 = arith.constant 16 : index
        %c0_25 = arith.constant 0 : index
        %139 = vector.load %arg5[%c16, %c0_25] : memref<32x128xf32, #tpu.memory_space<vmem>>, vector<1x128xf32>
        %140 = vector.broadcast %138 : vector<32x1xf32> to vector<32x128xf32>
        %141 = vector.broadcast %139 : vector<1x128xf32> to vector<32x128xf32>
        %142 = arith.minimumf %140, %141 : vector<32x128xf32>
        %143 = arith.addf %137, %142 : vector<32x128xf32>
        %144 = vector.extract_strided_slice %27 {offsets = [0, 17], sizes = [32, 1], strides = [1, 1]} : vector<32x32xf32> to vector<32x1xf32>
        %c17 = arith.constant 17 : index
        %c0_26 = arith.constant 0 : index
        %145 = vector.load %arg5[%c17, %c0_26] : memref<32x128xf32, #tpu.memory_space<vmem>>, vector<1x128xf32>
        %146 = vector.broadcast %144 : vector<32x1xf32> to vector<32x128xf32>
        %147 = vector.broadcast %145 : vector<1x128xf32> to vector<32x128xf32>
        %148 = arith.minimumf %146, %147 : vector<32x128xf32>
        %149 = arith.addf %143, %148 : vector<32x128xf32>
        %150 = vector.extract_strided_slice %27 {offsets = [0, 18], sizes = [32, 1], strides = [1, 1]} : vector<32x32xf32> to vector<32x1xf32>
        %c18 = arith.constant 18 : index
        %c0_27 = arith.constant 0 : index
        %151 = vector.load %arg5[%c18, %c0_27] : memref<32x128xf32, #tpu.memory_space<vmem>>, vector<1x128xf32>
        %152 = vector.broadcast %150 : vector<32x1xf32> to vector<32x128xf32>
        %153 = vector.broadcast %151 : vector<1x128xf32> to vector<32x128xf32>
        %154 = arith.minimumf %152, %153 : vector<32x128xf32>
        %155 = arith.addf %149, %154 : vector<32x128xf32>
        %156 = vector.extract_strided_slice %27 {offsets = [0, 19], sizes = [32, 1], strides = [1, 1]} : vector<32x32xf32> to vector<32x1xf32>
        %c19 = arith.constant 19 : index
        %c0_28 = arith.constant 0 : index
        %157 = vector.load %arg5[%c19, %c0_28] : memref<32x128xf32, #tpu.memory_space<vmem>>, vector<1x128xf32>
        %158 = vector.broadcast %156 : vector<32x1xf32> to vector<32x128xf32>
        %159 = vector.broadcast %157 : vector<1x128xf32> to vector<32x128xf32>
        %160 = arith.minimumf %158, %159 : vector<32x128xf32>
        %161 = arith.addf %155, %160 : vector<32x128xf32>
        %162 = vector.extract_strided_slice %27 {offsets = [0, 20], sizes = [32, 1], strides = [1, 1]} : vector<32x32xf32> to vector<32x1xf32>
        %c20 = arith.constant 20 : index
        %c0_29 = arith.constant 0 : index
        %163 = vector.load %arg5[%c20, %c0_29] : memref<32x128xf32, #tpu.memory_space<vmem>>, vector<1x128xf32>
        %164 = vector.broadcast %162 : vector<32x1xf32> to vector<32x128xf32>
        %165 = vector.broadcast %163 : vector<1x128xf32> to vector<32x128xf32>
        %166 = arith.minimumf %164, %165 : vector<32x128xf32>
        %167 = arith.addf %161, %166 : vector<32x128xf32>
        %168 = vector.extract_strided_slice %27 {offsets = [0, 21], sizes = [32, 1], strides = [1, 1]} : vector<32x32xf32> to vector<32x1xf32>
        %c21 = arith.constant 21 : index
        %c0_30 = arith.constant 0 : index
        %169 = vector.load %arg5[%c21, %c0_30] : memref<32x128xf32, #tpu.memory_space<vmem>>, vector<1x128xf32>
        %170 = vector.broadcast %168 : vector<32x1xf32> to vector<32x128xf32>
        %171 = vector.broadcast %169 : vector<1x128xf32> to vector<32x128xf32>
        %172 = arith.minimumf %170, %171 : vector<32x128xf32>
        %173 = arith.addf %167, %172 : vector<32x128xf32>
        %174 = vector.extract_strided_slice %27 {offsets = [0, 22], sizes = [32, 1], strides = [1, 1]} : vector<32x32xf32> to vector<32x1xf32>
        %c22 = arith.constant 22 : index
        %c0_31 = arith.constant 0 : index
        %175 = vector.load %arg5[%c22, %c0_31] : memref<32x128xf32, #tpu.memory_space<vmem>>, vector<1x128xf32>
        %176 = vector.broadcast %174 : vector<32x1xf32> to vector<32x128xf32>
        %177 = vector.broadcast %175 : vector<1x128xf32> to vector<32x128xf32>
        %178 = arith.minimumf %176, %177 : vector<32x128xf32>
        %179 = arith.addf %173, %178 : vector<32x128xf32>
        %180 = vector.extract_strided_slice %27 {offsets = [0, 23], sizes = [32, 1], strides = [1, 1]} : vector<32x32xf32> to vector<32x1xf32>
        %c23 = arith.constant 23 : index
        %c0_32 = arith.constant 0 : index
        %181 = vector.load %arg5[%c23, %c0_32] : memref<32x128xf32, #tpu.memory_space<vmem>>, vector<1x128xf32>
        %182 = vector.broadcast %180 : vector<32x1xf32> to vector<32x128xf32>
        %183 = vector.broadcast %181 : vector<1x128xf32> to vector<32x128xf32>
        %184 = arith.minimumf %182, %183 : vector<32x128xf32>
        %185 = arith.addf %179, %184 : vector<32x128xf32>
        %186 = vector.extract_strided_slice %27 {offsets = [0, 24], sizes = [32, 1], strides = [1, 1]} : vector<32x32xf32> to vector<32x1xf32>
        %c24 = arith.constant 24 : index
        %c0_33 = arith.constant 0 : index
        %187 = vector.load %arg5[%c24, %c0_33] : memref<32x128xf32, #tpu.memory_space<vmem>>, vector<1x128xf32>
        %188 = vector.broadcast %186 : vector<32x1xf32> to vector<32x128xf32>
        %189 = vector.broadcast %187 : vector<1x128xf32> to vector<32x128xf32>
        %190 = arith.minimumf %188, %189 : vector<32x128xf32>
        %191 = arith.addf %185, %190 : vector<32x128xf32>
        %192 = vector.extract_strided_slice %27 {offsets = [0, 25], sizes = [32, 1], strides = [1, 1]} : vector<32x32xf32> to vector<32x1xf32>
        %c25 = arith.constant 25 : index
        %c0_34 = arith.constant 0 : index
        %193 = vector.load %arg5[%c25, %c0_34] : memref<32x128xf32, #tpu.memory_space<vmem>>, vector<1x128xf32>
        %194 = vector.broadcast %192 : vector<32x1xf32> to vector<32x128xf32>
        %195 = vector.broadcast %193 : vector<1x128xf32> to vector<32x128xf32>
        %196 = arith.minimumf %194, %195 : vector<32x128xf32>
        %197 = arith.addf %191, %196 : vector<32x128xf32>
        %198 = vector.extract_strided_slice %27 {offsets = [0, 26], sizes = [32, 1], strides = [1, 1]} : vector<32x32xf32> to vector<32x1xf32>
        %c26 = arith.constant 26 : index
        %c0_35 = arith.constant 0 : index
        %199 = vector.load %arg5[%c26, %c0_35] : memref<32x128xf32, #tpu.memory_space<vmem>>, vector<1x128xf32>
        %200 = vector.broadcast %198 : vector<32x1xf32> to vector<32x128xf32>
        %201 = vector.broadcast %199 : vector<1x128xf32> to vector<32x128xf32>
        %202 = arith.minimumf %200, %201 : vector<32x128xf32>
        %203 = arith.addf %197, %202 : vector<32x128xf32>
        %204 = vector.extract_strided_slice %27 {offsets = [0, 27], sizes = [32, 1], strides = [1, 1]} : vector<32x32xf32> to vector<32x1xf32>
        %c27 = arith.constant 27 : index
        %c0_36 = arith.constant 0 : index
        %205 = vector.load %arg5[%c27, %c0_36] : memref<32x128xf32, #tpu.memory_space<vmem>>, vector<1x128xf32>
        %206 = vector.broadcast %204 : vector<32x1xf32> to vector<32x128xf32>
        %207 = vector.broadcast %205 : vector<1x128xf32> to vector<32x128xf32>
        %208 = arith.minimumf %206, %207 : vector<32x128xf32>
        %209 = arith.addf %203, %208 : vector<32x128xf32>
        %210 = vector.extract_strided_slice %27 {offsets = [0, 28], sizes = [32, 1], strides = [1, 1]} : vector<32x32xf32> to vector<32x1xf32>
        %c28 = arith.constant 28 : index
        %c0_37 = arith.constant 0 : index
        %211 = vector.load %arg5[%c28, %c0_37] : memref<32x128xf32, #tpu.memory_space<vmem>>, vector<1x128xf32>
        %212 = vector.broadcast %210 : vector<32x1xf32> to vector<32x128xf32>
        %213 = vector.broadcast %211 : vector<1x128xf32> to vector<32x128xf32>
        %214 = arith.minimumf %212, %213 : vector<32x128xf32>
        %215 = arith.addf %209, %214 : vector<32x128xf32>
        %216 = vector.extract_strided_slice %27 {offsets = [0, 29], sizes = [32, 1], strides = [1, 1]} : vector<32x32xf32> to vector<32x1xf32>
        %c29 = arith.constant 29 : index
        %c0_38 = arith.constant 0 : index
        %217 = vector.load %arg5[%c29, %c0_38] : memref<32x128xf32, #tpu.memory_space<vmem>>, vector<1x128xf32>
        %218 = vector.broadcast %216 : vector<32x1xf32> to vector<32x128xf32>
        %219 = vector.broadcast %217 : vector<1x128xf32> to vector<32x128xf32>
        %220 = arith.minimumf %218, %219 : vector<32x128xf32>
        %221 = arith.addf %215, %220 : vector<32x128xf32>
        %222 = vector.extract_strided_slice %27 {offsets = [0, 30], sizes = [32, 1], strides = [1, 1]} : vector<32x32xf32> to vector<32x1xf32>
        %c30 = arith.constant 30 : index
        %c0_39 = arith.constant 0 : index
        %223 = vector.load %arg5[%c30, %c0_39] : memref<32x128xf32, #tpu.memory_space<vmem>>, vector<1x128xf32>
        %224 = vector.broadcast %222 : vector<32x1xf32> to vector<32x128xf32>
        %225 = vector.broadcast %223 : vector<1x128xf32> to vector<32x128xf32>
        %226 = arith.minimumf %224, %225 : vector<32x128xf32>
        %227 = arith.addf %221, %226 : vector<32x128xf32>
        %228 = vector.extract_strided_slice %27 {offsets = [0, 31], sizes = [32, 1], strides = [1, 1]} : vector<32x32xf32> to vector<32x1xf32>
        %c31 = arith.constant 31 : index
        %c0_40 = arith.constant 0 : index
        %229 = vector.load %arg5[%c31, %c0_40] : memref<32x128xf32, #tpu.memory_space<vmem>>, vector<1x128xf32>
        %230 = vector.broadcast %228 : vector<32x1xf32> to vector<32x128xf32>
        %231 = vector.broadcast %229 : vector<1x128xf32> to vector<32x128xf32>
        %232 = arith.minimumf %230, %231 : vector<32x128xf32>
        %233 = arith.addf %227, %232 : vector<32x128xf32>
        %234 = vector.broadcast %16 : f32 to vector<32x128xf32>
        %235 = arith.addf %233, %234 : vector<32x128xf32>
        %236 = arith.mulf %235, %40 : vector<32x128xf32>
        %cst_41 = arith.constant 0.000000e+00 : f32
        %237 = vector.broadcast %cst_41 : f32 to vector<32x128xf32>
        %238 = arith.maximumf %236, %237 : vector<32x128xf32>
        %239 = arith.index_cast %25 : i32 to index
        %c0_42 = arith.constant 0 : index
        %240 = vector.load %arg9[%239, %c0_42] : memref<128x128xf32, #tpu.memory_space<vmem>>, vector<32x128xf32>
        tpu.vector_store %arg9[%239, %c0_42], %238 {strides = array<i32>} : memref<128x128xf32, #tpu.memory_space<vmem>>, vector<32x128xf32>,
        %241 = arith.index_cast %25 : i32 to index
        %c0_43 = arith.constant 0 : index
        %242 = vector.load %arg10[%241, %c0_43] : memref<128x128xf32, #tpu.memory_space<vmem>>, vector<32x128xf32>
        tpu.vector_store %arg10[%241, %c0_43], %40 {strides = array<i32>} : memref<128x128xf32, #tpu.memory_space<vmem>>, vector<32x128xf32>,
      }
      %c4_i32_4 = arith.constant 4 : i32
    } else {
    }
    return
  }
  func.func @transform_0(%arg0: i32, %arg1: i32, %arg2: memref<1xi32, #tpu.memory_space<smem>>, %arg3: memref<1xi32, #tpu.memory_space<smem>>) -> (i32, i32) {
    %c0_i32 = arith.constant 0 : i32
    %c0_i32_0 = arith.constant 0 : i32
    return %arg0, %c0_i32 : i32, i32
  }
  func.func @transform_1(%arg0: i32, %arg1: i32, %arg2: memref<1xi32, #tpu.memory_space<smem>>, %arg3: memref<1xi32, #tpu.memory_space<smem>>) -> (i32, i32) {
    %c0_i32 = arith.constant 0 : i32
    %c0_i32_0 = arith.constant 0 : i32
    return %c0_i32, %arg1 : i32, i32
  }
  func.func @transform_2(%arg0: i32, %arg1: i32, %arg2: memref<1xi32, #tpu.memory_space<smem>>, %arg3: memref<1xi32, #tpu.memory_space<smem>>) -> (i32, i32) {
    %c0_i32 = arith.constant 0 : i32
    %c0_i32_0 = arith.constant 0 : i32
    return %arg0, %c0_i32 : i32, i32
  }
  func.func @transform_3(%arg0: i32, %arg1: i32, %arg2: memref<1xi32, #tpu.memory_space<smem>>, %arg3: memref<1xi32, #tpu.memory_space<smem>>) -> (i32, i32) {
    %c0_i32 = arith.constant 0 : i32
    %c0_i32_0 = arith.constant 0 : i32
    return %c0_i32, %arg1 : i32, i32
  }
  func.func @transform_4(%arg0: i32, %arg1: i32, %arg2: memref<1xi32, #tpu.memory_space<smem>>, %arg3: memref<1xi32, #tpu.memory_space<smem>>) -> i32 {
    %c0_i32 = arith.constant 0 : i32
    %c0_i32_0 = arith.constant 0 : i32
    return %c0_i32 : i32
  }
  func.func @transform_5(%arg0: i32, %arg1: i32, %arg2: memref<1xi32, #tpu.memory_space<smem>>, %arg3: memref<1xi32, #tpu.memory_space<smem>>) -> (i32, i32) {
    %c0_i32 = arith.constant 0 : i32
    return %arg0, %arg1 : i32, i32
  }
  func.func @transform_6(%arg0: i32, %arg1: i32, %arg2: memref<1xi32, #tpu.memory_space<smem>>, %arg3: memref<1xi32, #tpu.memory_space<smem>>) -> (i32, i32) {
    %c0_i32 = arith.constant 0 : i32
    return %arg0, %arg1 : i32, i32
  }
}

</mosaic_0001>

<bundles_post_ra>
// kernel: tpu_custom_call.1
= control target key start
LH: loop header
LB: loop body
LE: loop exit
PB: predicated region body
PF: predicated region fallthrough
CT: control target
= control target key end

     0   :  { %s1957_s0 = inlined_call_operand.<no memory space> [shape: s32[1], index: 0, kind: input, shape index: {}]   ;;  %s1958_s1 = inlined_call_operand.<no memory space> [shape: s32[1], index: 1, kind: input, shape index: {}]   ;;  %s1959_s2 = inlined_call_operand.vmem [shape: f32[128,32], index: 2, kind: input, shape index: {}]   ;;  %s1960_s3 = inlined_call_operand.vmem [shape: f32[32,128], index: 3, kind: input, shape index: {}]   ;;  %s1961_s4 = inlined_call_operand.vmem [shape: s32[128,1], index: 4, kind: input, shape index: {}]   ;;  %s1962_s5 = inlined_call_operand.vmem [shape: s32[1,128], index: 5, kind: input, shape index: {}]   ;;  %s1963_s6 = inlined_call_operand.<no memory space> [shape: f32[1], index: 6, kind: input, shape index: {}]   ;;  %s1964_s7 = inlined_call_operand.hbm [shape: f32[128,128], index: 7, kind: output, shape index: {0}]   ;;  %s1965_s8 = inlined_call_operand.hbm [shape: f32[128,128], index: 8, kind: output, shape index: {1}]  }
   0x1   :  { %16 = sst [smem:[#allocation5]] %s1963_s6 }
   0x2   :  { %17 = vsyncpa [#allocation7], 0 }
   0x3   :  { %18 = vsyncpa [#allocation9], 0  ;;  %p31_p0 = scmp.ge.s32.totalorder %s1958_s1, %s1957_s0 }
   0x5   :  { %p1444_p1 = pnand %p31_p0, %p31_p0 }
   0x6   :  { %s1450_s12 = sld [smem:[#allocation5]] (!%p1444_p1)  ;;  %s1478_s0 = smov (!%p1444_p1), 0  }
   0x7   :  { %38 = sbr.rel (%p1444_p1) target bundleno = 508 (0x1fc), region = 25 }
   0xc   :  { %v1455_v0 = vld [vmem:[%s1962_s5] ss:$0 sm:$0xff]  ;;  %v41_v1 = vlaneseq }
   0xe   :  { %v1457_v2 = vshrl.u32 %v41_v1, 7  ;;  %v1459_v3 = vand.u32 127, %v41_v1 }
  0x10   :  { %v1462_v4 = vadd.s32 8, %v1457_v2  ;;  %v1465_v5 = vadd.s32 16, %v1457_v2  ;;  %v1468_v6 = vadd.s32 24, %v1457_v2  ;;  %v48_v7 = vsub.s32 %v1457_v2, %v1459_v3 }
  0x12   :  { %v49_v8 = vsub.s32 %v1462_v4, %v1459_v3  ;;  %v50_v9 = vsub.s32 %v1465_v5, %v1459_v3  ;;  %v51_v10 = vsub.s32 %v1468_v6, %v1459_v3 }
  0x13 LB: > { %v1352_v11 = vmov 0   ;;  %s1484_s1 = sshll.u32 %s1350_s0, 5  ;;  %v1353_v20 = vmov 1   ;;  %v1354_v21 = vmov 2   ;;  %v1355_v22 = vmov 3   ;;  %s59_s0 = sadd.s32 1, %s1350_s0   ;;  %s1350_s0 = sphi %s1478_s0, %s59_s0  }
  0x14   : > { %1233 = vset.pattern.permute.xlu1 %v1352_v11  ;;  %1232 = vset.pattern.permute.xlu0 %v1352_v11  ;;  %s66_s15 = scalar_lea.vmem %s1961_s4, %s1484_s1  ;;  %s61_s18 = scalar_lea.vmem %s1959_s2, %s1484_s1  ;;  %v1356_v23 = vmov 4   ;;  %v1357_v24 = vmov 5   ;;  %v1358_v25 = vmov 6   ;;  %v1359_v26 = vmov 7   ;;  %v1597_v56 = vld [vmem:[%s1960_s3] ss:$0 sm:$0xff] }
  0x15   : > { %v69_v12 = vld [vmem:[%s66_s15 + $0x10] sm:$0xff]  ;;  %v67_v13 = vld [vmem:[%s66_s15] sm:$0xff]  ;;  %v70_v14 = vld [vmem:[%s66_s15 + $0x18] sm:$0xff]  ;;  %v1360_v27 = vmov 8   ;;  %v1361_v28 = vmov 9   ;;  %v1362_v29 = vmov 10   ;;  %v92_v34 = vstv %s1484_s1 }
  0x16   : > { %78 = vperm.xlu1 %1233, %v69_v12   ;;  %72 = vperm.xlu0 %1232, %v67_v13   ;;  %v68_v15 = vld [vmem:[%s66_s15 + $0x8] sm:$0xff]  ;;  %v1496_v17 = vld [vmem:[%s61_s18] sm:$0xff]  ;;  %v1499_v18 = vld [vmem:[%s61_s18 + $0x18] sm:$0xff]  ;;  %v1363_v30 = vmov 11   ;;  %v1364_v31 = vmov 12   ;;  %v1365_v32 = vmov 13   ;;  %v95_v36 = vadd.s32 %v92_v34, %v50_v9 }
  0x17   : > { %v1494_v16 = vld [vmem:[%s61_s18 + $0x8] sm:$0xff]  ;;  %v1502_v19 = vld [vmem:[%s61_s18 + $0x10] sm:$0xff]  ;;  %v1366_v33 = vmov 14   ;;  %v1367_v35 = vmov 15   ;;  %v93_v37 = vadd.s32 %v92_v34, %v48_v7  ;;  %v96_v38 = vadd.s32 %v92_v34, %v51_v10  ;;  %s1576_s19 = scalar_lea.vmem [#allocation8], %s1484_s1  ;;  %s1058_s21 = scalar_lea.vmem [#allocation6], %s1484_s1 }
  0x18   : > { %vm99_vm0 = vcmp.ne.s32.totalorder %v95_v36, 0  ;;  %v94_v40 = vadd.s32 %v92_v34, %v49_v8  ;;  %v1368_v42 = vmov 16   ;;  %v1369_v43 = vmov 0.0   ;;  %v1605_v59 = vld [vmem:[%s1960_s3 + $0x1] ss:$0 sm:$0xff]  ;;  %p56_p2 = scmp.ge.s32.totalorder %s59_s0, 4  }
  0x19   : > { %vm97_vm1 = vcmp.ne.s32.totalorder %v93_v37, 0  ;;  %vm100_vm6 = vcmp.ne.s32.totalorder %v96_v38, 0  ;;  %v1370_v48 = vmov 17   ;;  %v1371_v55 = vmov 18   ;;  %v1619_v12 = vld [vmem:[%s1960_s3 + $0x2] ss:$0 sm:$0xff] }
  0x1a   : > { %81 = vperm.xlu1 %1233, %v70_v14   ;;  %75 = vperm.xlu0 %1232, %v68_v15   ;;  %vm98_vm7 = vcmp.ne.s32.totalorder %v94_v40, 0  ;;  %v1372_v62 = vmov 19  }
  0x1e   : > { %121 = vperm.xlu1 %1233, %v1494_v16   ;;  %116 = vperm.xlu0 %1232, %v1496_v17  }
  0x22   : > { %131 = vperm.xlu1 %1233, %v1499_v18   ;;  %126 = vperm.xlu0 %1232, %v1502_v19  }
  0x26   : > { %1235 = vset.pattern.permute.xlu1 %v1353_v20  ;;  %1234 = vset.pattern.permute.xlu0 %v1353_v20  ;;  %v1373_v20 = vmov 20  }
  0x27   : > { %152 = vperm.xlu1 %1235, %v1494_v16   ;;  %148 = vperm.xlu0 %1234, %v1496_v17  }
  0x2b   : > { %156 = vperm.xlu1 %1235, %v1502_v19   ;;  %160 = vperm.xlu0 %1234, %v1499_v18  }
  0x2f   : > { %1236 = vset.pattern.permute.xlu1 %v1354_v21  ;;  %1237 = vset.pattern.permute.xlu0 %v1354_v21 }
  0x30   : > { %177 = vperm.xlu1 %1236, %v1496_v17   ;;  %181 = vperm.xlu0 %1237, %v1494_v16  }
  0x34   : > { %185 = vperm.xlu1 %1236, %v1502_v19   ;;  %1238 = vset.pattern.permute.xlu0 %v1355_v22 }
  0x35   : > { %206 = vperm.xlu0 %1238, %v1496_v17  }
  0x38   : > { %189 = vperm.xlu1 %1236, %v1499_v18  }
  0x39   : > { %218 = vperm.xlu0 %1238, %v1499_v18  }
  0x3c   : > { %1239 = vset.pattern.permute.xlu1 %v1355_v22  ;;  %v1629_v22 = vld [vmem:[%s1960_s3 + $0x3] ss:$0 sm:$0xff] }
  0x3d   : > { %210 = vperm.xlu1 %1239, %v1494_v16   ;;  %1241 = vset.pattern.permute.xlu0 %v1356_v23 }
  0x3e   : > { %239 = vperm.xlu0 %1241, %v1494_v16  }
  0x41   : > { %214 = vperm.xlu1 %1239, %v1502_v19  }
  0x42   : > { %1242 = vset.pattern.permute.xlu0 %v1357_v24 }
  0x43   : > { %264 = vperm.xlu0 %1242, %v1496_v17  }
  0x45   : > { %1240 = vset.pattern.permute.xlu1 %v1356_v23 }
  0x46   : > { %235 = vperm.xlu1 %1240, %v1496_v17  }
  0x47   : > { %276 = vperm.xlu0 %1242, %v1499_v18  }
  0x4a   : > { %243 = vperm.xlu1 %1240, %v1502_v19  }
  0x4b   : > { %1245 = vset.pattern.permute.xlu0 %v1358_v25 }
  0x4c   : > { %297 = vperm.xlu0 %1245, %v1494_v16  }
  0x4e   : > { %247 = vperm.xlu1 %1240, %v1499_v18  }
  0x50   : > { %1246 = vset.pattern.permute.xlu0 %v1359_v26 }
  0x51   : > { %322 = vperm.xlu0 %1246, %v1496_v17  }
  0x52   : > { %1243 = vset.pattern.permute.xlu1 %v1357_v24 }
  0x53   : > { %268 = vperm.xlu1 %1243, %v1494_v16  }
  0x55   : > { %334 = vperm.xlu0 %1246, %v1499_v18  }
  0x57   : > { %272 = vperm.xlu1 %1243, %v1502_v19  }
  0x59   : > { %1249 = vset.pattern.permute.xlu0 %v1360_v27 }
  0x5a   : > { %355 = vperm.xlu0 %1249, %v1494_v16  }
  0x5b   : > { %1244 = vset.pattern.permute.xlu1 %v1358_v25 }
  0x5c   : > { %293 = vperm.xlu1 %1244, %v1496_v17  }
  0x5e   : > { %1250 = vset.pattern.permute.xlu0 %v1361_v28 }
  0x5f   : > { %380 = vperm.xlu0 %1250, %v1496_v17  }
  0x60   : > { %301 = vperm.xlu1 %1244, %v1502_v19  }
  0x63   : > { %392 = vperm.xlu0 %1250, %v1499_v18  }
  0x64   : > { %305 = vperm.xlu1 %1244, %v1499_v18  }
  0x67   : > { %1253 = vset.pattern.permute.xlu0 %v1362_v29 }
  0x68   : > { %1247 = vset.pattern.permute.xlu1 %v1359_v26  ;;  %413 = vperm.xlu0 %1253, %v1494_v16  }
  0x69   : > { %326 = vperm.xlu1 %1247, %v1494_v16  }
  0x6c   : > { %1254 = vset.pattern.permute.xlu0 %v1363_v30 }
  0x6d   : > { %330 = vperm.xlu1 %1247, %v1502_v19   ;;  %438 = vperm.xlu0 %1254, %v1496_v17  }
  0x71   : > { %1248 = vset.pattern.permute.xlu1 %v1360_v27  ;;  %450 = vperm.xlu0 %1254, %v1499_v18  }
  0x72   : > { %351 = vperm.xlu1 %1248, %v1496_v17  }
  0x75   : > { %1257 = vset.pattern.permute.xlu0 %v1364_v31 }
  0x76   : > { %359 = vperm.xlu1 %1248, %v1502_v19   ;;  %471 = vperm.xlu0 %1257, %v1494_v16  }
  0x7a   : > { %363 = vperm.xlu1 %1248, %v1499_v18   ;;  %1258 = vset.pattern.permute.xlu0 %v1365_v32 }
  0x7b   : > { %496 = vperm.xlu0 %1258, %v1496_v17  }
  0x7e   : > { %1251 = vset.pattern.permute.xlu1 %v1361_v28 }
  0x7f   : > { %384 = vperm.xlu1 %1251, %v1494_v16   ;;  %508 = vperm.xlu0 %1258, %v1499_v18  }
  0x83   : > { %388 = vperm.xlu1 %1251, %v1502_v19   ;;  %1261 = vset.pattern.permute.xlu0 %v1366_v33 }
  0x84   : > { %529 = vperm.xlu0 %1261, %v1494_v16  }
  0x87   : > { %1252 = vset.pattern.permute.xlu1 %v1362_v29 }
  0x88   : > { %409 = vperm.xlu1 %1252, %v1496_v17   ;;  %1262 = vset.pattern.permute.xlu0 %v1367_v35 }
  0x89   : > { %554 = vperm.xlu0 %1262, %v1496_v17  }
  0x8c   : > { %417 = vperm.xlu1 %1252, %v1502_v19  }
  0x8d   : > { %566 = vperm.xlu0 %1262, %v1499_v18  }
  0x90   : > { %421 = vperm.xlu1 %1252, %v1499_v18  }
  0x91   : > { %v79_v39 = vpop.permute.xlu1 %78  ;;  %v73_v41 = vpop.permute.xlu0 %72  ;;  %1265 = vset.pattern.permute.xlu0 %v1368_v42 }
  0x92   : > { %vm89_vm2 = vcmp.eq.s32.totalorder %v79_v39, %v1455_v0  ;;  %vm87_vm4 = vcmp.eq.s32.totalorder %v73_v41, %v1455_v0  ;;  %587 = vperm.xlu0 %1265, %v1494_v16  }
  0x93   : > { %vm103_vm3 = vmand %vm89_vm2, %vm99_vm0 }
  0x94   : > { %v1152_v44 = vsel %vm103_vm3, 1.0, %v1369_v43  ;;  %vm101_vm5 = vmand %vm87_vm4, %vm97_vm1  ;;  %1255 = vset.pattern.permute.xlu1 %v1363_v30  ;;  %v1374_v30 = vmov 21  }
  0x95   : > { %1066 = vst [vmem:[%s1576_s19 + $0x10] sm:$0xff] %v1152_v44  ;;  %v1150_v45 = vsel %vm101_vm5, 1.0, %v1369_v43  ;;  %v82_v46 = vpop.permute.xlu1 %81  ;;  %442 = vperm.xlu1 %1255, %v1494_v16   ;;  %v76_v47 = vpop.permute.xlu0 %75  ;;  %v1648_v44 = vld [vmem:[%s1960_s3 + $0x4] ss:$0 sm:$0xff] }
  0x96   : > { %1064 = vst [vmem:[%s1576_s19] sm:$0xff] %v1150_v45  ;;  %vm90_vm8 = vcmp.eq.s32.totalorder %v82_v46, %v1455_v0  ;;  %vm88_vm10 = vcmp.eq.s32.totalorder %v76_v47, %v1455_v0  ;;  %1266 = vset.pattern.permute.xlu0 %v1370_v48 }
  0x97   : > { %vm104_vm9 = vmand %vm90_vm8, %vm100_vm6  ;;  %612 = vperm.xlu0 %1266, %v1496_v17  }
  0x98   : > { %v1153_v49 = vsel %vm104_vm9, 1.0, %v1369_v43  ;;  %vm102_vm11 = vmand %vm88_vm10, %vm98_vm7 }
  0x99   : > { %1067 = vst [vmem:[%s1576_s19 + $0x18] sm:$0xff] %v1153_v49  ;;  %v1151_v50 = vsel %vm102_vm11, 1.0, %v1369_v43  ;;  %v122_v51 = vpop.permute.xlu1 %121  ;;  %446 = vperm.xlu1 %1255, %v1502_v19   ;;  %v117_v52 = vpop.permute.xlu0 %116 }
  0x9a   : > { %1065 = vst [vmem:[%s1576_s19 + $0x8] sm:$0xff] %v1151_v50  ;;  %v138_v57 = vmax.f32 %v117_v52, %v1597_v56  ;;  %v139_v36 = vmax.f32 %v122_v51, %v1597_v56  ;;  %v1375_v52 = vmov 22  }
  0x9b   : > { %624 = vperm.xlu0 %1266, %v1499_v18  }
  0x9d   : > { %v132_v53 = vpop.permute.xlu1 %131  ;;  %1256 = vset.pattern.permute.xlu1 %v1364_v31  ;;  %v1591_v54 = vpop.permute.xlu0 %126 }
  0x9e   : > { %467 = vperm.xlu1 %1256, %v1496_v17   ;;  %v141_v25 = vmax.f32 %v132_v53, %v1597_v56 }
  0x9f   : > { %1269 = vset.pattern.permute.xlu0 %v1371_v55 }
  0xa0   : > { %645 = vperm.xlu0 %1269, %v1494_v16  }
  0xa2   : > { %v153_v58 = vpop.permute.xlu1 %152  ;;  %475 = vperm.xlu1 %1256, %v1502_v19   ;;  %v149_v60 = vpop.permute.xlu0 %148 }
  0xa3   : > { %v167_v61 = vmax.f32 %v149_v60, %v1605_v59  ;;  %v168_v28 = vmax.f32 %v153_v58, %v1605_v59 }
  0xa4   : > { %1270 = vset.pattern.permute.xlu0 %v1372_v62 }
  0xa5   : > { %v171_v63 = vadd.f32 %v167_v61, %v138_v57  ;;  %670 = vperm.xlu0 %1270, %v1496_v17   ;;  %v172_v40 = vadd.f32 %v168_v28, %v139_v36  ;;  %v1661_v57 = vld [vmem:[%s1960_s3 + $0x5] ss:$0 sm:$0xff]  ;;  %v1376_v61 = vmov 23   ;;  %v1682_v28 = vld [vmem:[%s1960_s3 + $0x6] ss:$0 sm:$0xff]  ;;  %v1378_v36 = vmov 25  }
  0xa6   : > { %v1609_v1 = vpop.permute.xlu1 %156  ;;  %479 = vperm.xlu1 %1256, %v1499_v18   ;;  %v161_v11 = vpop.permute.xlu0 %160 }
  0xa7   : > { %v170_v23 = vmax.f32 %v161_v11, %v1605_v59 }
  0xa9   : > { %682 = vperm.xlu0 %1270, %v1499_v18   ;;  %v174_v31 = vadd.f32 %v170_v23, %v141_v25 }
  0xaa   : > { %1259 = vset.pattern.permute.xlu1 %v1365_v32 }
  0xab   : > { %500 = vperm.xlu1 %1259, %v1494_v16   ;;  %v178_v13 = vpop.permute.xlu1 %177  ;;  %v182_v14 = vpop.permute.xlu0 %181 }
  0xac   : > { %v196_v15 = vmax.f32 %v178_v13, %v1619_v12  ;;  %v197_v37 = vmax.f32 %v182_v14, %v1619_v12 }
  0xad   : > { %1273 = vset.pattern.permute.xlu0 %v1373_v20 }
  0xae   : > { %703 = vperm.xlu0 %1273, %v1494_v16   ;;  %v200_v26 = vadd.f32 %v196_v15, %v171_v63  ;;  %v201_v45 = vadd.f32 %v197_v37, %v172_v40 }
  0xaf   : > { %504 = vperm.xlu1 %1259, %v1502_v19   ;;  %v1624_v21 = vpop.permute.xlu1 %185 }
  0xb0   : > { %v207_v24 = vpop.permute.xlu0 %206 }
  0xb1   : > { %v225_v27 = vmax.f32 %v207_v24, %v1629_v22 }
  0xb2   : > { %1274 = vset.pattern.permute.xlu0 %v1374_v30 }
  0xb3   : > { %1260 = vset.pattern.permute.xlu1 %v1366_v33  ;;  %v190_v29 = vpop.permute.xlu1 %189  ;;  %v229_v32 = vadd.f32 %v225_v27, %v200_v26  ;;  %728 = vperm.xlu0 %1274, %v1496_v17   ;;  %v1377_v26 = vmov 24  }
  0xb4   : > { %v199_v34 = vmax.f32 %v190_v29, %v1619_v12  ;;  %525 = vperm.xlu1 %1260, %v1496_v17   ;;  %v219_v38 = vpop.permute.xlu0 %218 }
  0xb5   : > { %v228_v33 = vmax.f32 %v219_v38, %v1629_v22 }
  0xb6   : > { %v203_v39 = vadd.f32 %v199_v34, %v174_v31 }
  0xb7   : > { %740 = vperm.xlu0 %1274, %v1499_v18  }
  0xb8   : > { %v232_v41 = vadd.f32 %v228_v33, %v203_v39  ;;  %533 = vperm.xlu1 %1260, %v1502_v19   ;;  %v211_v43 = vpop.permute.xlu1 %210  ;;  %v1696_v33 = vld [vmem:[%s1960_s3 + $0x7] ss:$0 sm:$0xff] }
  0xb9   : > { %v226_v46 = vmax.f32 %v211_v43, %v1629_v22  ;;  %v240_v47 = vpop.permute.xlu0 %239 }
  0xba   : > { %v255_v50 = vmax.f32 %v240_v47, %v1648_v44 }
  0xbb   : > { %v230_v49 = vadd.f32 %v226_v46, %v201_v45  ;;  %1277 = vset.pattern.permute.xlu0 %v1375_v52  ;;  %v1379_v46 = vmov 26  }
  0xbc   : > { %537 = vperm.xlu1 %1260, %v1499_v18   ;;  %v1654_v51 = vpop.permute.xlu1 %214  ;;  %761 = vperm.xlu0 %1277, %v1494_v16  }
  0xbd   : > { %v259_v53 = vadd.f32 %v255_v50, %v230_v49 }
  0xbe   : > { %v265_v58 = vpop.permute.xlu0 %264 }
  0xbf   : > { %v283_v11 = vmax.f32 %v265_v58, %v1661_v57 }
  0xc0   : > { %1263 = vset.pattern.permute.xlu1 %v1367_v35  ;;  %1278 = vset.pattern.permute.xlu0 %v1376_v61 }
  0xc1   : > { %558 = vperm.xlu1 %1263, %v1494_v16   ;;  %v236_v60 = vpop.permute.xlu1 %235  ;;  %786 = vperm.xlu0 %1278, %v1496_v17  }
  0xc2   : > { %v254_v63 = vmax.f32 %v236_v60, %v1648_v44  ;;  %v277_v23 = vpop.permute.xlu0 %276 }
  0xc3   : > { %v286_v25 = vmax.f32 %v277_v23, %v1661_v57 }
  0xc4   : > { %v258_v13 = vadd.f32 %v254_v63, %v229_v32 }
  0xc5   : > { %562 = vperm.xlu1 %1263, %v1502_v19   ;;  %v1670_v14 = vpop.permute.xlu1 %243  ;;  %798 = vperm.xlu0 %1278, %v1499_v18  }
  0xc6   : > { %v287_v15 = vadd.f32 %v283_v11, %v258_v13  ;;  %v1716_v13 = vld [vmem:[%s1960_s3 + $0x8] ss:$0 sm:$0xff] }
  0xc7   : > { %v298_v29 = vpop.permute.xlu0 %297 }
  0xc8   : > { %v313_v34 = vmax.f32 %v298_v29, %v1682_v28 }
  0xc9   : > { %1264 = vset.pattern.permute.xlu1 %v1368_v42  ;;  %v248_v35 = vpop.permute.xlu1 %247  ;;  %1281 = vset.pattern.permute.xlu0 %v1377_v26 }
  0xca   : > { %v257_v24 = vmax.f32 %v248_v35, %v1648_v44  ;;  %583 = vperm.xlu1 %1264, %v1496_v17   ;;  %819 = vperm.xlu0 %1281, %v1494_v16  }
  0xcc   : > { %v261_v27 = vadd.f32 %v257_v24, %v232_v41  ;;  %v323_v40 = vpop.permute.xlu0 %322 }
  0xcd   : > { %v341_v45 = vmax.f32 %v323_v40, %v1696_v33 }
  0xce   : > { %v290_v42 = vadd.f32 %v286_v25, %v261_v27  ;;  %591 = vperm.xlu1 %1264, %v1502_v19   ;;  %v269_v31 = vpop.permute.xlu1 %268  ;;  %1282 = vset.pattern.permute.xlu0 %v1378_v36  ;;  %v1381_v25 = vmov 28  }
  0xcf   : > { %v284_v32 = vmax.f32 %v269_v31, %v1661_v57  ;;  %844 = vperm.xlu0 %1282, %v1496_v17   ;;  %v1730_v31 = vld [vmem:[%s1960_s3 + $0x9] ss:$0 sm:$0xff] }
  0xd1   : > { %v288_v37 = vadd.f32 %v284_v32, %v259_v53  ;;  %v335_v53 = vpop.permute.xlu0 %334 }
  0xd2   : > { %595 = vperm.xlu1 %1264, %v1499_v18   ;;  %v1690_v38 = vpop.permute.xlu1 %272  ;;  %v344_v63 = vmax.f32 %v335_v53, %v1696_v33  ;;  %v1383_v53 = vmov 30  }
  0xd3   : > { %v317_v39 = vadd.f32 %v313_v34, %v288_v37  ;;  %856 = vperm.xlu0 %1282, %v1499_v18   ;;  %v1382_v34 = vmov 29  }
  0xd6   : > { %1267 = vset.pattern.permute.xlu1 %v1370_v48  ;;  %v1380_v48 = vmov 27  }
  0xd7   : > { %616 = vperm.xlu1 %1267, %v1494_v16   ;;  %v294_v41 = vpop.permute.xlu1 %293  ;;  %1285 = vset.pattern.permute.xlu0 %v1379_v46 }
  0xd8   : > { %v312_v43 = vmax.f32 %v294_v41, %v1682_v28  ;;  %877 = vperm.xlu0 %1285, %v1494_v16  }
  0xda   : > { %v316_v47 = vadd.f32 %v312_v43, %v287_v15  ;;  %v356_v15 = vpop.permute.xlu0 %355 }
  0xdb   : > { %620 = vperm.xlu1 %1267, %v1502_v19   ;;  %v1705_v49 = vpop.permute.xlu1 %301  ;;  %v371_v24 = vmax.f32 %v356_v15, %v1716_v13  ;;  %v1384_v15 = vmov 31  }
  0xdc   : > { %v345_v50 = vadd.f32 %v341_v45, %v316_v47  ;;  %1286 = vset.pattern.permute.xlu0 %v1380_v48 }
  0xdd   : > { %902 = vperm.xlu0 %1286, %v1496_v17  }
  0xde   : > { %v381_v32 = vpop.permute.xlu0 %380 }
  0xdf   : > { %1268 = vset.pattern.permute.xlu1 %v1371_v55  ;;  %v306_v58 = vpop.permute.xlu1 %305  ;;  %v399_v40 = vmax.f32 %v381_v32, %v1730_v31 }
  0xe0   : > { %v315_v60 = vmax.f32 %v306_v58, %v1682_v28  ;;  %641 = vperm.xlu1 %1268, %v1496_v17  }
  0xe1   : > { %914 = vperm.xlu0 %1286, %v1499_v18  }
  0xe2   : > { %v319_v11 = vadd.f32 %v315_v60, %v290_v42  ;;  %v393_v47 = vpop.permute.xlu0 %392 }
  0xe4   : > { %v348_v23 = vadd.f32 %v344_v63, %v319_v11  ;;  %649 = vperm.xlu1 %1268, %v1502_v19   ;;  %v327_v55 = vpop.permute.xlu1 %326  ;;  %v1751_v63 = vld [vmem:[%s1960_s3 + $0xa] ss:$0 sm:$0xff] }
  0xe5   : > { %v342_v35 = vmax.f32 %v327_v55, %v1696_v33  ;;  %1289 = vset.pattern.permute.xlu0 %v1381_v25 }
  0xe6   : > { %935 = vperm.xlu0 %1289, %v1494_v16   ;;  %v414_v11 = vpop.permute.xlu0 %413 }
  0xe7   : > { %v346_v27 = vadd.f32 %v342_v35, %v317_v39 }
  0xe8   : > { %653 = vperm.xlu1 %1268, %v1499_v18   ;;  %v1725_v29 = vpop.permute.xlu1 %330 }
  0xe9   : > { %v375_v42 = vadd.f32 %v371_v24, %v346_v27  ;;  %v429_v24 = vmax.f32 %v414_v11, %v1751_v63 }
  0xea   : > { %1290 = vset.pattern.permute.xlu0 %v1382_v34 }
  0xeb   : > { %960 = vperm.xlu0 %1290, %v1496_v17  }
  0xec   : > { %1271 = vset.pattern.permute.xlu1 %v1372_v62 }
  0xed   : > { %674 = vperm.xlu1 %1271, %v1494_v16   ;;  %v352_v37 = vpop.permute.xlu1 %351 }
  0xee   : > { %v370_v39 = vmax.f32 %v352_v37, %v1716_v13  ;;  %v1165_v37 = vld [vmem:[%s1960_s3 + $0xb] ss:$0 sm:$0xff] }
  0xef   : > { %972 = vperm.xlu0 %1290, %v1499_v18  }
  0xf0   : > { %v374_v41 = vadd.f32 %v370_v39, %v345_v50  ;;  %v402_v50 = vmax.f32 %v393_v47, %v1730_v31  ;;  %v439_v39 = vpop.permute.xlu0 %438 }
  0xf1   : > { %678 = vperm.xlu1 %1271, %v1502_v19   ;;  %v1740_v43 = vpop.permute.xlu1 %359  ;;  %v457_v47 = vmax.f32 %v439_v39, %v1165_v37 }
  0xf2   : > { %v403_v45 = vadd.f32 %v399_v40, %v374_v41 }
  0xf3   : > { %1293 = vset.pattern.permute.xlu0 %v1383_v53 }
  0xf4   : > { %993 = vperm.xlu0 %1293, %v1494_v16   ;;  %v451_v11 = vpop.permute.xlu0 %450 }
  0xf5   : > { %1272 = vset.pattern.permute.xlu1 %v1373_v20  ;;  %v364_v62 = vpop.permute.xlu1 %363 }
  0xf6   : > { %v373_v58 = vmax.f32 %v364_v62, %v1716_v13  ;;  %699 = vperm.xlu1 %1272, %v1496_v17   ;;  %v169_v62 = vmax.f32 %v1609_v1, %v1605_v59  ;;  %v460_v1 = vmax.f32 %v451_v11, %v1165_v37 }
  0xf8   : > { %v377_v60 = vadd.f32 %v373_v58, %v348_v23  ;;  %1294 = vset.pattern.permute.xlu0 %v1384_v15 }
  0xf9   : > { %1018 = vperm.xlu0 %1294, %v1496_v17  }
  0xfa   : > { %v406_v20 = vadd.f32 %v402_v50, %v377_v60  ;;  %707 = vperm.xlu1 %1272, %v1502_v19   ;;  %v385_v55 = vpop.permute.xlu1 %384  ;;  %v198_v60 = vmax.f32 %v1624_v21, %v1619_v12  ;;  %v285_v12 = vmax.f32 %v1690_v38, %v1661_v57  ;;  %v343_v57 = vmax.f32 %v1725_v29, %v1696_v33 }
  0xfb   : > { %v400_v35 = vmax.f32 %v385_v55, %v1730_v31 }
  0xfd   : > { %v404_v23 = vadd.f32 %v400_v35, %v375_v42  ;;  %1030 = vperm.xlu0 %1294, %v1499_v18   ;;  %v140_v42 = vmax.f32 %v1591_v54, %v1597_v56  ;;  %v227_v35 = vmax.f32 %v1654_v51, %v1629_v22  ;;  %v256_v56 = vmax.f32 %v1670_v14, %v1648_v44  ;;  %v1166_v22 = vld [vmem:[%s1960_s3 + $0xc] ss:$0 sm:$0xff]  ;;  %v472_v51 = vpop.permute.xlu0 %471 }
  0xfe   : > { %711 = vperm.xlu1 %1272, %v1499_v18   ;;  %v389_v27 = vpop.permute.xlu1 %388 }
  0xff   : > { %v433_v32 = vadd.f32 %v429_v24, %v404_v23  ;;  %v173_v55 = vadd.f32 %v169_v62, %v140_v42  ;;  %v314_v23 = vmax.f32 %v1705_v49, %v1682_v28  ;;  %v401_v49 = vmax.f32 %v389_v27, %v1730_v31 }
 0x101   : > { %v202_v54 = vadd.f32 %v198_v60, %v173_v55  ;;  %v497_v60 = vpop.permute.xlu0 %496 }
 0x102   : > { %1275 = vset.pattern.permute.xlu1 %v1374_v30 }
 0x103   : > { %732 = vperm.xlu1 %1275, %v1494_v16   ;;  %v410_v40 = vpop.permute.xlu1 %409 }
 0x104   : > { %v428_v41 = vmax.f32 %v410_v40, %v1751_v63  ;;  %v487_v40 = vmax.f32 %v472_v51, %v1166_v22 }
 0x106   : > { %v432_v58 = vadd.f32 %v428_v41, %v403_v45  ;;  %v231_v45 = vadd.f32 %v227_v35, %v202_v54 }
 0x107   : > { %736 = vperm.xlu1 %1275, %v1502_v19   ;;  %v418_v50 = vpop.permute.xlu1 %417 }
 0x108   : > { %v461_v30 = vadd.f32 %v457_v47, %v432_v58  ;;  %v372_v47 = vmax.f32 %v1740_v43, %v1716_v13  ;;  %v1167_v58 = vld [vmem:[%s1960_s3 + $0xd] ss:$0 sm:$0xff]  ;;  %v430_v33 = vmax.f32 %v418_v50, %v1751_v63 }
 0x109   : > { %v515_v55 = vmax.f32 %v497_v60, %v1167_v58 }
 0x10b   : > { %1276 = vset.pattern.permute.xlu1 %v1375_v52  ;;  %v422_v24 = vpop.permute.xlu1 %421  ;;  %v260_v52 = vadd.f32 %v256_v56, %v231_v45 }
 0x10c   : > { %v431_v59 = vmax.f32 %v422_v24, %v1751_v63  ;;  %757 = vperm.xlu1 %1276, %v1496_v17  }
 0x10d   : > { %v289_v41 = vadd.f32 %v285_v12, %v260_v52 }
 0x10e   : > { %v435_v21 = vadd.f32 %v431_v59, %v406_v20  ;;  %v509_v59 = vpop.permute.xlu0 %508 }
 0x10f   : > { %v318_v20 = vadd.f32 %v314_v23, %v289_v41  ;;  %v518_v50 = vmax.f32 %v509_v59, %v1167_v58 }
 0x110   : > { %v464_v44 = vadd.f32 %v460_v1, %v435_v21  ;;  %765 = vperm.xlu1 %1276, %v1502_v19   ;;  %v443_v14 = vpop.permute.xlu1 %442 }
 0x111   : > { %v458_v39 = vmax.f32 %v443_v14, %v1165_v37  ;;  %v347_v28 = vadd.f32 %v343_v57, %v318_v20 }
 0x112   : > { %v530_v45 = vpop.permute.xlu0 %529 }
 0x113   : > { %v462_v38 = vadd.f32 %v458_v39, %v433_v32  ;;  %v376_v11 = vadd.f32 %v372_v47, %v347_v28 }
 0x114   : > { %769 = vperm.xlu1 %1276, %v1499_v18   ;;  %v447_v42 = vpop.permute.xlu1 %446 }
 0x115   : > { %v491_v62 = vadd.f32 %v487_v40, %v462_v38  ;;  %v405_v29 = vadd.f32 %v401_v49, %v376_v11  ;;  %v459_v43 = vmax.f32 %v447_v42, %v1165_v37 }
 0x116   : > { %v555_v40 = vpop.permute.xlu0 %554 }
 0x117   : > { %v434_v35 = vadd.f32 %v430_v33, %v405_v29  ;;  %v1170_v33 = vld [vmem:[%s1960_s3 + $0x10] ss:$0 sm:$0xff] }
 0x118   : > { %1279 = vset.pattern.permute.xlu1 %v1376_v61 }
 0x119   : > { %790 = vperm.xlu1 %1279, %v1494_v16   ;;  %v468_v13 = vpop.permute.xlu1 %467  ;;  %v463_v27 = vadd.f32 %v459_v43, %v434_v35 }
 0x11a   : > { %v486_v32 = vmax.f32 %v468_v13, %v1166_v22  ;;  %v567_v28 = vpop.permute.xlu0 %566 }
 0x11c   : > { %v490_v24 = vadd.f32 %v486_v32, %v461_v30  ;;  %v1168_v30 = vld [vmem:[%s1960_s3 + $0xe] ss:$0 sm:$0xff] }
 0x11d   : > { %794 = vperm.xlu1 %1279, %v1502_v19   ;;  %v476_v31 = vpop.permute.xlu1 %475  ;;  %v545_v52 = vmax.f32 %v530_v45, %v1168_v30 }
 0x11e   : > { %v519_v54 = vadd.f32 %v515_v55, %v490_v24  ;;  %v488_v56 = vmax.f32 %v476_v31, %v1166_v22  ;;  %v588_v13 = vpop.permute.xlu0 %587 }
 0x11f   : > { %v603_v55 = vmin.f32 %v588_v13, %v1170_v33 }
 0x120   : > { %v492_v1 = vadd.f32 %v488_v56, %v463_v27 }
 0x121   : > { %1280 = vset.pattern.permute.xlu1 %v1377_v26  ;;  %v480_v61 = vpop.permute.xlu1 %479 }
 0x122   : > { %v489_v63 = vmax.f32 %v480_v61, %v1166_v22  ;;  %815 = vperm.xlu1 %1280, %v1496_v17  }
 0x124   : > { %v493_v37 = vadd.f32 %v489_v63, %v464_v44  ;;  %v1169_v44 = vld [vmem:[%s1960_s3 + $0xf] ss:$0 sm:$0xff] }
 0x125   : > { %v573_v38 = vmax.f32 %v555_v40, %v1169_v44 }
 0x126   : > { %v522_v12 = vadd.f32 %v518_v50, %v493_v37  ;;  %823 = vperm.xlu1 %1280, %v1502_v19   ;;  %v501_v21 = vpop.permute.xlu1 %500 }
 0x127   : > { %v516_v51 = vmax.f32 %v501_v21, %v1167_v58  ;;  %v613_v21 = vpop.permute.xlu0 %612 }
 0x129   : > { %v520_v23 = vadd.f32 %v516_v51, %v491_v62 }
 0x12a   : > { %827 = vperm.xlu1 %1280, %v1499_v18   ;;  %v505_v26 = vpop.permute.xlu1 %504 }
 0x12b   : > { %v549_v22 = vadd.f32 %v545_v52, %v520_v23  ;;  %v517_v14 = vmax.f32 %v505_v26, %v1167_v58 }
 0x12d   : > { %v521_v39 = vadd.f32 %v517_v14, %v492_v1 }
 0x12e   : > { %1283 = vset.pattern.permute.xlu1 %v1378_v36  ;;  %v576_v36 = vmax.f32 %v567_v28, %v1169_v44 }
 0x12f   : > { %848 = vperm.xlu1 %1283, %v1494_v16   ;;  %v526_v41 = vpop.permute.xlu1 %525 }
 0x130   : > { %v544_v57 = vmax.f32 %v526_v41, %v1168_v30 }
 0x132   : > { %v548_v20 = vadd.f32 %v544_v57, %v519_v54 }
 0x133   : > { %852 = vperm.xlu1 %1283, %v1502_v19   ;;  %v534_v47 = vpop.permute.xlu1 %533 }
 0x134   : > { %v577_v42 = vadd.f32 %v573_v38, %v548_v20  ;;  %v546_v62 = vmax.f32 %v534_v47, %v1168_v30 }
 0x136   : > { %v550_v49 = vadd.f32 %v546_v62, %v521_v39 }
 0x137   : > { %1284 = vset.pattern.permute.xlu1 %v1379_v46  ;;  %v538_v58 = vpop.permute.xlu1 %537 }
 0x138   : > { %v547_v60 = vmax.f32 %v538_v58, %v1168_v30  ;;  %873 = vperm.xlu1 %1284, %v1496_v17  }
 0x13a   : > { %v551_v11 = vadd.f32 %v547_v60, %v522_v12  ;;  %v1173_v60 = vld [vmem:[%s1960_s3 + $0x13] ss:$0 sm:$0xff] }
 0x13c   : > { %v580_v29 = vadd.f32 %v576_v36, %v551_v11  ;;  %881 = vperm.xlu1 %1284, %v1502_v19   ;;  %v559_v43 = vpop.permute.xlu1 %558 }
 0x13d   : > { %v574_v32 = vmax.f32 %v559_v43, %v1169_v44 }
 0x13f   : > { %v578_v35 = vadd.f32 %v574_v32, %v549_v22  ;;  %v1172_v22 = vld [vmem:[%s1960_s3 + $0x12] ss:$0 sm:$0xff] }
 0x140   : > { %885 = vperm.xlu1 %1284, %v1499_v18   ;;  %v563_v46 = vpop.permute.xlu1 %562 }
 0x141   : > { %v607_v24 = vadd.f32 %v603_v55, %v578_v35  ;;  %v575_v31 = vmax.f32 %v563_v46, %v1169_v44  ;;  %v625_v44 = vpop.permute.xlu0 %624 }
 0x143   : > { %v579_v27 = vadd.f32 %v575_v31, %v550_v49 }
 0x144   : > { %1287 = vset.pattern.permute.xlu1 %v1380_v48  ;;  %v1171_v48 = vld [vmem:[%s1960_s3 + $0x11] ss:$0 sm:$0xff] }
 0x145   : > { %906 = vperm.xlu1 %1287, %v1494_v16   ;;  %v584_v54 = vpop.permute.xlu1 %583  ;;  %v634_v38 = vmin.f32 %v625_v44, %v1171_v48  ;;  %v646_v47 = vpop.permute.xlu0 %645 }
 0x146   : > { %v602_v56 = vmin.f32 %v584_v54, %v1170_v33  ;;  %v661_v49 = vmin.f32 %v646_v47, %v1172_v22 }
 0x148   : > { %v606_v59 = vadd.f32 %v602_v56, %v577_v42 }
 0x149   : > { %910 = vperm.xlu1 %1287, %v1502_v19   ;;  %v592_v1 = vpop.permute.xlu1 %591  ;;  %v671_v13 = vpop.permute.xlu0 %670 }
 0x14a   : > { %v604_v61 = vmin.f32 %v592_v1, %v1170_v33  ;;  %v689_v32 = vmin.f32 %v671_v13, %v1173_v60 }
 0x14c   : > { %v608_v63 = vadd.f32 %v604_v61, %v579_v27 }
 0x14d   : > { %1288 = vset.pattern.permute.xlu1 %v1381_v25  ;;  %v596_v50 = vpop.permute.xlu1 %595  ;;  %v631_v25 = vmin.f32 %v613_v21, %v1171_v48 }
 0x14e   : > { %v605_v37 = vmin.f32 %v596_v50, %v1170_v33  ;;  %931 = vperm.xlu1 %1288, %v1496_v17  }
 0x14f   : > { %v635_v39 = vadd.f32 %v631_v25, %v606_v59  ;;  %v1176_v25 = vld [vmem:[%s1960_s3 + $0x16] ss:$0 sm:$0xff] }
 0x150   : > { %v609_v30 = vadd.f32 %v605_v37, %v580_v29 }
 0x152   : > { %939 = vperm.xlu1 %1288, %v1502_v19   ;;  %v617_v45 = vpop.permute.xlu1 %616  ;;  %v638_v62 = vadd.f32 %v634_v38, %v609_v30 }
 0x153   : > { %v632_v12 = vmin.f32 %v617_v45, %v1171_v48 }
 0x155   : > { %v636_v51 = vadd.f32 %v632_v12, %v607_v24  ;;  %v683_v24 = vpop.permute.xlu0 %682 }
 0x156   : > { %943 = vperm.xlu1 %1288, %v1499_v18   ;;  %v621_v52 = vpop.permute.xlu1 %620  ;;  %v692_v54 = vmin.f32 %v683_v24, %v1173_v60 }
 0x157   : > { %v633_v23 = vmin.f32 %v621_v52, %v1171_v48  ;;  %v665_v11 = vadd.f32 %v661_v49, %v636_v51  ;;  %v1177_v49 = vld [vmem:[%s1960_s3 + $0x17] ss:$0 sm:$0xff] }
 0x159   : > { %v637_v26 = vadd.f32 %v633_v23, %v608_v63  ;;  %v704_v59 = vpop.permute.xlu0 %703 }
 0x15a   : > { %1291 = vset.pattern.permute.xlu1 %v1382_v34 }
 0x15b   : > { %964 = vperm.xlu1 %1291, %v1494_v16   ;;  %v642_v14 = vpop.permute.xlu1 %641 }
 0x15c   : > { %v660_v40 = vmin.f32 %v642_v14, %v1172_v22 }
 0x15d   : > { %v729_v12 = vpop.permute.xlu0 %728 }
 0x15e   : > { %v664_v41 = vadd.f32 %v660_v40, %v635_v39 }
 0x15f   : > { %968 = vperm.xlu1 %1291, %v1502_v19   ;;  %v650_v57 = vpop.permute.xlu1 %649 }
 0x160   : > { %v662_v20 = vmin.f32 %v650_v57, %v1172_v22  ;;  %v693_v46 = vadd.f32 %v689_v32, %v664_v41 }
 0x161   : > { %v741_v14 = vpop.permute.xlu0 %740 }
 0x162   : > { %v666_v42 = vadd.f32 %v662_v20, %v637_v26 }
 0x163   : > { %1292 = vset.pattern.permute.xlu1 %v1383_v53  ;;  %v654_v34 = vpop.permute.xlu1 %653 }
 0x164   : > { %v663_v28 = vmin.f32 %v654_v34, %v1172_v22  ;;  %989 = vperm.xlu1 %1292, %v1496_v17   ;;  %v1174_v17 = vld [vmem:[%s1960_s3 + $0x14] ss:$0 sm:$0xff] }
 0x165   : > { %v719_v50 = vmin.f32 %v704_v59, %v1174_v17  ;;  %v762_v38 = vpop.permute.xlu0 %761 }
 0x166   : > { %v667_v58 = vadd.f32 %v663_v28, %v638_v62  ;;  %v777_v62 = vmin.f32 %v762_v38, %v1176_v25 }
 0x168   : > { %997 = vperm.xlu1 %1292, %v1502_v19   ;;  %v675_v36 = vpop.permute.xlu1 %674 }
 0x169   : > { %v690_v33 = vmin.f32 %v675_v36, %v1173_v60  ;;  %v787_v32 = vpop.permute.xlu0 %786 }
 0x16b   : > { %v694_v29 = vadd.f32 %v690_v33, %v665_v11 }
 0x16c   : > { %1001 = vperm.xlu1 %1292, %v1499_v18   ;;  %v679_v53 = vpop.permute.xlu1 %678 }
 0x16d   : > { %v691_v43 = vmin.f32 %v679_v53, %v1173_v60  ;;  %v723_v48 = vadd.f32 %v719_v50, %v694_v29 }
 0x16f   : > { %v695_v55 = vadd.f32 %v691_v43, %v666_v42 }
 0x170   : > { %1295 = vset.pattern.permute.xlu1 %v1384_v15  ;;  %v696_v15 = vadd.f32 %v692_v54, %v667_v58 }
 0x171   : > { %1022 = vperm.xlu1 %1295, %v1494_v16   ;;  %v700_v35 = vpop.permute.xlu1 %699  ;;  %v1175_v16 = vld [vmem:[%s1960_s3 + $0x15] ss:$0 sm:$0xff] }
 0x172   : > { %v718_v31 = vmin.f32 %v700_v35, %v1174_v17  ;;  %v747_v52 = vmin.f32 %v729_v12, %v1175_v16  ;;  %v750_v41 = vmin.f32 %v741_v14, %v1175_v16  ;;  %v1891_v14 = vld [vmem:[%s1960_s3 + $0x1b] ss:$0 sm:$0xff] }
 0x174   : > { %v722_v27 = vadd.f32 %v718_v31, %v693_v46 }
 0x175   : > { %1026 = vperm.xlu1 %1295, %v1502_v19   ;;  %v708_v18 = vpop.permute.xlu1 %707 }
 0x176   : > { %v720_v56 = vmin.f32 %v708_v18, %v1174_v17  ;;  %v751_v22 = vadd.f32 %v747_v52, %v722_v27 }
 0x178   : > { %v724_v1 = vadd.f32 %v720_v56, %v695_v55 }
 0x179   : > { %v712_v61 = vpop.permute.xlu1 %711 }
 0x17a   : > { %v721_v63 = vmin.f32 %v712_v61, %v1174_v17  ;;  %v799_v17 = vpop.permute.xlu0 %798 }
 0x17c   : > { %v725_v37 = vadd.f32 %v721_v63, %v696_v15 }
 0x17e   : > { %v733_v30 = vpop.permute.xlu1 %732  ;;  %v754_v42 = vadd.f32 %v750_v41, %v725_v37  ;;  %v820_v24 = vpop.permute.xlu0 %819  ;;  %v805_v37 = vmin.f32 %v787_v32, %v1177_v49 }
 0x17f   : > { %v748_v45 = vmin.f32 %v733_v30, %v1175_v16 }
 0x181   : > { %v752_v21 = vadd.f32 %v748_v45, %v723_v48  ;;  %v1877_v45 = vld [vmem:[%s1960_s3 + $0x19] ss:$0 sm:$0xff] }
 0x182   : > { %v737_v19 = vpop.permute.xlu1 %736  ;;  %v845_v31 = vpop.permute.xlu0 %844 }
 0x183   : > { %v749_v51 = vmin.f32 %v737_v19, %v1175_v16  ;;  %v781_v60 = vadd.f32 %v777_v62, %v752_v21  ;;  %v1178_v16 = vld [vmem:[%s1960_s3 + $0x18] ss:$0 sm:$0xff]  ;;  %v863_v52 = vmin.f32 %v845_v31, %v1877_v45 }
 0x185   : > { %v753_v23 = vadd.f32 %v749_v51, %v724_v1 }
 0x186   : > { %v857_v18 = vpop.permute.xlu0 %856 }
 0x187   : > { %v758_v26 = vpop.permute.xlu1 %757  ;;  %v866_v62 = vmin.f32 %v857_v18, %v1877_v45 }
 0x188   : > { %v776_v39 = vmin.f32 %v758_v26, %v1176_v25  ;;  %v808_v26 = vmin.f32 %v799_v17, %v1177_v49 }
 0x18a   : > { %v780_v44 = vadd.f32 %v776_v39, %v751_v22  ;;  %v878_v59 = vpop.permute.xlu0 %877 }
 0x18b   : > { %v766_v40 = vpop.permute.xlu1 %765 }
 0x18c   : > { %v778_v57 = vmin.f32 %v766_v40, %v1176_v25  ;;  %v809_v21 = vadd.f32 %v805_v37, %v780_v44 }
 0x18e   : > { %v782_v20 = vadd.f32 %v778_v57, %v753_v23  ;;  %v903_v61 = vpop.permute.xlu0 %902  ;;  %v1885_v23 = vld [vmem:[%s1960_s3 + $0x1a] ss:$0 sm:$0xff] }
 0x18f   : > { %v770_v47 = vpop.permute.xlu1 %769  ;;  %v921_v38 = vmin.f32 %v903_v61, %v1891_v14  ;;  %v893_v31 = vmin.f32 %v878_v59, %v1885_v23 }
 0x190   : > { %v779_v34 = vmin.f32 %v770_v47, %v1176_v25  ;;  %v835_v47 = vmin.f32 %v820_v24, %v1178_v16 }
 0x192   : > { %v783_v28 = vadd.f32 %v779_v34, %v754_v42  ;;  %v915_v63 = vpop.permute.xlu0 %914  ;;  %v1897_v42 = vld [vmem:[%s1960_s3 + $0x1c] ss:$0 sm:$0xff] }
 0x193   : > { %v924_v61 = vmin.f32 %v915_v63, %v1891_v14 }
 0x194   : > { %v791_v58 = vpop.permute.xlu1 %790  ;;  %v812_v41 = vadd.f32 %v808_v26, %v783_v28  ;;  %v1905_v28 = vld [vmem:[%s1960_s3 + $0x1d] ss:$0 sm:$0xff] }
 0x195   : > { %v806_v36 = vmin.f32 %v791_v58, %v1177_v49 }
 0x196   : > { %v1872_v30 = vpop.permute.xlu0 %935 }
 0x197   : > { %v810_v11 = vadd.f32 %v806_v36, %v781_v60 }
 0x198   : > { %v795_v33 = vpop.permute.xlu1 %794 }
 0x199   : > { %v807_v13 = vmin.f32 %v795_v33, %v1177_v49 }
 0x19a   : > { %v961_v19 = vpop.permute.xlu0 %960 }
 0x19b   : > { %v1859_v29 = vadd.f32 %v807_v13, %v782_v20  ;;  %v979_v17 = vmin.f32 %v961_v19, %v1905_v28 }
 0x19d   : > { %v816_v53 = vpop.permute.xlu1 %815 }
 0x19e   : > { %v834_v48 = vmin.f32 %v816_v53, %v1178_v16  ;;  %v973_v39 = vpop.permute.xlu0 %972  ;;  %v839_v53 = vadd.f32 %v835_v47, %v810_v11  ;;  %v1184_v11 = vld [vmem:[%s1960_s3 + $0x1e] ss:$0 sm:$0xff] }
 0x1a0   : > { %v838_v51 = vadd.f32 %v834_v48, %v809_v21 }
 0x1a1   : > { %v1861_v43 = vpop.permute.xlu1 %823 }
 0x1a2   : > { %v867_v44 = vadd.f32 %v863_v52, %v838_v51  ;;  %v994_v60 = vpop.permute.xlu0 %993  ;;  %v836_v19 = vmin.f32 %v1861_v43, %v1178_v16 }
 0x1a5   : > { %v828_v55 = vpop.permute.xlu1 %827 }
 0x1a6   : > { %v837_v40 = vmin.f32 %v828_v55, %v1178_v16 }
 0x1a8   : > { %v841_v34 = vadd.f32 %v837_v40, %v812_v41 }
 0x1aa   : > { %v849_v35 = vpop.permute.xlu1 %848  ;;  %v870_v32 = vadd.f32 %v866_v62, %v841_v34 }
 0x1ab   : > { %v864_v58 = vmin.f32 %v849_v35, %v1877_v45  ;;  %v1913_v35 = vld [vmem:[%s1960_s3 + $0x1f] ss:$0 sm:$0xff] }
 0x1ad   : > { %v868_v24 = vadd.f32 %v864_v58, %v839_v53  ;;  %v1296_v58 = vld [vmem:[%s1576_s19] sm:$0xff] }
 0x1ae   : > { %v1863_v46 = vpop.permute.xlu1 %852 }
 0x1af   : > { %v897_v51 = vadd.f32 %v893_v31, %v868_v24  ;;  %v865_v63 = vmin.f32 %v1863_v46, %v1877_v45 }
 0x1b3   : > { %v874_v27 = vpop.permute.xlu1 %873 }
 0x1b4   : > { %v892_v22 = vmin.f32 %v874_v27, %v1885_v23  ;;  %v1019_v27 = vpop.permute.xlu0 %1018 }
 0x1b5   : > { %v1037_v21 = vmin.f32 %v1019_v27, %v1913_v35 }
 0x1b6   : > { %v896_v57 = vadd.f32 %v892_v22, %v867_v44  ;;  %v951_v22 = vmin.f32 %v1872_v30, %v1897_v42  ;;  %v1045_v44 = vstv %s1450_s12 }
 0x1b7   : > { %v1865_v54 = vpop.permute.xlu1 %881 }
 0x1b8   : > { %v925_v36 = vadd.f32 %v921_v38, %v896_v57  ;;  %v840_v38 = vadd.f32 %v836_v19, %v1859_v29  ;;  %v894_v43 = vmin.f32 %v1865_v54, %v1885_v23  ;;  %v1031_v47 = vpop.permute.xlu0 %1030 }
 0x1b9   : > { %v1040_v29 = vmin.f32 %v1031_v47, %v1913_v35 }
 0x1ba   : > { %v869_v45 = vadd.f32 %v865_v63, %v840_v38 }
 0x1bb   : > { %v886_v56 = vpop.permute.xlu1 %885 }
 0x1bc   : > { %v895_v33 = vmin.f32 %v886_v56, %v1885_v23 }
 0x1be   : > { %v899_v18 = vadd.f32 %v895_v33, %v870_v32  ;;  %v898_v33 = vadd.f32 %v894_v43, %v869_v45 }
 0x1c0   : > { %v907_v1 = vpop.permute.xlu1 %906  ;;  %v928_v52 = vadd.f32 %v924_v61, %v899_v18 }
 0x1c1   : > { %v922_v56 = vmin.f32 %v907_v1, %v1891_v14 }
 0x1c3   : > { %v926_v1 = vadd.f32 %v922_v56, %v897_v51 }
 0x1c4   : > { %v1867_v15 = vpop.permute.xlu1 %910 }
 0x1c5   : > { %v955_v34 = vadd.f32 %v951_v22, %v926_v1  ;;  %v923_v30 = vmin.f32 %v1867_v15, %v1891_v14 }
 0x1c9   : > { %v932_v50 = vpop.permute.xlu1 %931 }
 0x1ca   : > { %v950_v49 = vmin.f32 %v932_v50, %v1897_v42 }
 0x1cc   : > { %v954_v55 = vadd.f32 %v950_v49, %v925_v36 }
 0x1cd   : > { %v1879_v12 = vpop.permute.xlu1 %939 }
 0x1ce   : > { %v983_v37 = vadd.f32 %v979_v17, %v954_v55  ;;  %v952_v54 = vmin.f32 %v1879_v12, %v1897_v42  ;;  %v927_v55 = vadd.f32 %v923_v30, %v898_v33 }
 0x1d0   : > { %v956_v24 = vadd.f32 %v952_v54, %v927_v55 }
 0x1d1   : > { %v944_v25 = vpop.permute.xlu1 %943 }
 0x1d2   : > { %v953_v59 = vmin.f32 %v944_v25, %v1897_v42  ;;  %v982_v25 = vmin.f32 %v973_v39, %v1905_v28 }
 0x1d4   : > { %v957_v41 = vadd.f32 %v953_v59, %v928_v52  ;;  %v1299_v52 = vld [vmem:[%s1576_s19 + $0x10] sm:$0xff] }
 0x1d6   : > { %v965_v20 = vpop.permute.xlu1 %964  ;;  %v986_v49 = vadd.f32 %v982_v25, %v957_v41 }
 0x1d7   : > { %v980_v16 = vmin.f32 %v965_v20, %v1905_v28  ;;  %v1009_v20 = vmin.f32 %v994_v60, %v1184_v11  ;;  %v1297_v60 = vld [vmem:[%s1576_s19 + $0x18] sm:$0xff] }
 0x1d9   : > { %v984_v23 = vadd.f32 %v980_v16, %v955_v34 }
 0x1da   : > { %v969_v13 = vpop.permute.xlu1 %968 }
 0x1db   : > { %v981_v17 = vmin.f32 %v969_v13, %v1905_v28  ;;  %v1013_v31 = vadd.f32 %v1009_v20, %v984_v23 }
 0x1dd   : > { %v985_v12 = vadd.f32 %v981_v17, %v956_v24 }
 0x1df   : > { %v990_v50 = vpop.permute.xlu1 %989 }
 0x1e0   : > { %v1008_v48 = vmin.f32 %v990_v50, %v1184_v11 }
 0x1e2   : > { %v1012_v26 = vadd.f32 %v1008_v48, %v983_v37  ;;  %v1298_v48 = vld [vmem:[%s1576_s19 + $0x8] sm:$0xff] }
 0x1e3   : > { %v998_v40 = vpop.permute.xlu1 %997 }
 0x1e4   : > { %v1041_v57 = vadd.f32 %v1037_v21, %v1012_v26  ;;  %v1010_v27 = vmin.f32 %v998_v40, %v1184_v11 }
 0x1e6   : > { %v1046_v46 = vadd.f32 %v1045_v44, %v1041_v57  ;;  %v1014_v37 = vadd.f32 %v1010_v27, %v985_v12 }
 0x1e7   : > { %v1002_v62 = vpop.permute.xlu1 %1001 }
 0x1e8   : > { %v1050_v39 = vmul.f32 %v1296_v58, %v1046_v46  ;;  %v1011_v36 = vmin.f32 %v1002_v62, %v1184_v11 }
 0x1ea   : > { %v1054_v53 = vmax.f32 %v1050_v39, 0.0  ;;  %v1015_v32 = vadd.f32 %v1011_v36, %v986_v49 }
 0x1ec   : > { %1059 = vst [vmem:[%s1058_s21] sm:$0xff] %v1054_v53  ;;  %v1044_v15 = vadd.f32 %v1040_v29, %v1015_v32  ;;  %v1023_v14 = vpop.permute.xlu1 %1022 }
 0x1ed   : > { %v1038_v18 = vmin.f32 %v1023_v14, %v1913_v35 }
 0x1ee   : > { %v1049_v61 = vadd.f32 %v1045_v44, %v1044_v15 }
 0x1ef   : > { %v1042_v42 = vadd.f32 %v1038_v18, %v1013_v31 }
 0x1f0   : > { %v1053_v56 = vmul.f32 %v1297_v60, %v1049_v61  ;;  %v1027_v50 = vpop.permute.xlu1 %1026 }
 0x1f1   : > { %v1047_v59 = vadd.f32 %v1045_v44, %v1042_v42  ;;  %v1039_v28 = vmin.f32 %v1027_v50, %v1913_v35 }
 0x1f2   : > { %v1057_v13 = vmax.f32 %v1053_v56, 0.0 }
 0x1f3   : > { %v1051_v21 = vmul.f32 %v1298_v48, %v1047_v59  ;;  %v1043_v19 = vadd.f32 %v1039_v28, %v1014_v37 }
 0x1f4   : > { %1062 = vst [vmem:[%s1058_s21 + $0x18] sm:$0xff] %v1057_v13 }
 0x1f5   : > { %v1055_v51 = vmax.f32 %v1051_v21, 0.0  ;;  %v1048_v11 = vadd.f32 %v1045_v44, %v1043_v19 }
 0x1f7   : > { %1060 = vst [vmem:[%s1058_s21 + $0x8] sm:$0xff] %v1055_v51  ;;  %v1052_v26 = vmul.f32 %v1299_v52, %v1048_v11  ;;  %58 = sbr.rel (!%p56_p2) target bundleno = 19 (0x13), region = 67 }
 0x1f9   : > { %v1056_v63 = vmax.f32 %v1052_v26, 0.0 }
 0x1fb   : > { %1061 = vst [vmem:[%s1058_s21 + $0x10] sm:$0xff] %v1056_v63 }
 0x1fc PF:  { %1070 = sbr.rel (!%p1444_p1) target bundleno = 525 (0x20d), region = 36  ;;  %v1385_v35 = vmov (%p1444_p1), 0.0  }
 0x1fd   :  { %1071 = vst [vmem:[#allocation6] sm:$0xff] (%p1444_p1), %v1385_v35  ;;  %1072 = vst [vmem:[#allocation6 + $0x8] sm:$0xff] (%p1444_p1), %v1385_v35 }
 0x1fe   :  { %1073 = vst [vmem:[#allocation6 + $0x10] sm:$0xff] (%p1444_p1), %v1385_v35  ;;  %1074 = vst [vmem:[#allocation6 + $0x18] sm:$0xff] (%p1444_p1), %v1385_v35 }
 0x1ff   :  { %1075 = vst [vmem:[#allocation6 + $0x20] sm:$0xff] (%p1444_p1), %v1385_v35  ;;  %1076 = vst [vmem:[#allocation6 + $0x28] sm:$0xff] (%p1444_p1), %v1385_v35 }
 0x200   :  { %1077 = vst [vmem:[#allocation6 + $0x30] sm:$0xff] (%p1444_p1), %v1385_v35  ;;  %1078 = vst [vmem:[#allocation6 + $0x38] sm:$0xff] (%p1444_p1), %v1385_v35 }
 0x201   :  { %1079 = vst [vmem:[#allocation6 + $0x40] sm:$0xff] %v1385_v35  ;;  %1080 = vst [vmem:[#allocation6 + $0x48] sm:$0xff] %v1385_v35 }
 0x202   :  { %1081 = vst [vmem:[#allocation6 + $0x50] sm:$0xff] %v1385_v35  ;;  %1082 = vst [vmem:[#allocation6 + $0x58] sm:$0xff] %v1385_v35 }
 0x203   :  { %1083 = vst [vmem:[#allocation6 + $0x60] sm:$0xff] %v1385_v35  ;;  %1084 = vst [vmem:[#allocation6 + $0x68] sm:$0xff] %v1385_v35 }
 0x204   :  { %1085 = vst [vmem:[#allocation6 + $0x70] sm:$0xff] %v1385_v35  ;;  %1086 = vst [vmem:[#allocation6 + $0x78] sm:$0xff] %v1385_v35 }
 0x205   :  { %1087 = vst [vmem:[#allocation8] sm:$0xff] %v1385_v35  ;;  %1088 = vst [vmem:[#allocation8 + $0x8] sm:$0xff] %v1385_v35 }
 0x206   :  { %1089 = vst [vmem:[#allocation8 + $0x10] sm:$0xff] %v1385_v35  ;;  %1090 = vst [vmem:[#allocation8 + $0x18] sm:$0xff] %v1385_v35 }
 0x207   :  { %1091 = vst [vmem:[#allocation8 + $0x20] sm:$0xff] %v1385_v35  ;;  %1092 = vst [vmem:[#allocation8 + $0x28] sm:$0xff] %v1385_v35 }
 0x208   :  { %1093 = vst [vmem:[#allocation8 + $0x30] sm:$0xff] %v1385_v35  ;;  %1094 = vst [vmem:[#allocation8 + $0x38] sm:$0xff] %v1385_v35 }
 0x209   :  { %1095 = vst [vmem:[#allocation8 + $0x40] sm:$0xff] %v1385_v35  ;;  %1096 = vst [vmem:[#allocation8 + $0x48] sm:$0xff] %v1385_v35 }
 0x20a   :  { %1097 = vst [vmem:[#allocation8 + $0x50] sm:$0xff] %v1385_v35  ;;  %1098 = vst [vmem:[#allocation8 + $0x58] sm:$0xff] %v1385_v35 }
 0x20b   :  { %1099 = vst [vmem:[#allocation8 + $0x60] sm:$0xff] %v1385_v35  ;;  %1100 = vst [vmem:[#allocation8 + $0x68] sm:$0xff] %v1385_v35 }
 0x20c   :  { %1101 = vst [vmem:[#allocation8 + $0x70] sm:$0xff] %v1385_v35  ;;  %1102 = vst [vmem:[#allocation8 + $0x78] sm:$0xff] %v1385_v35 }
 0x20d PF:  { %s1386_s2 = smov [#allocation6]  }
 0x20e   :  { %s1108_s3 = sshll.u32 %s1386_s2, 4  ;;  %s1109_s3 = int_to_ptr.vmem [resolvable:$true] %s1108_s3 }
 0x20f   :  { %s1300_s4 = scalar_lea.vmem %s1109_s3, 2048  ;;  %p1305_p4 = scmp.lt.s32.totalorder %s1109_s3, %s1109_s3 }
 0x210   :  { %p1301_p3 = scmp.ne.s32.totalorder %s1109_s3, %s1300_s4  ;;  %p1306_p5 = scmp.lt.s32.totalorder %s1300_s4, %s1300_s4 }
 0x212   :  { %p1307_p6 = por %p1306_p5, %p1305_p4 }
 0x214   :  { %p1308_p7 = pnand %p1307_p6, %p1301_p3 }
 0x216   :  { %1311 = shalt.err (!%p1308_p7)
}
 0x217   :  { %s1387_s11 = smov 128   ;;  %s1388_s12 = smov 8  }
 0x218   :  { %1114 = dma.vmem_to_hbm [thread:$0]  %s1109_s3, 2048, %s1964_s7, [#allocation7], %s1387_s11, %s1387_s11, %s1388_s12  }
 0x219   :  { %s1389_s19 = smov [#allocation8]  }
 0x21a   :  { %s1120_s22 = sshll.u32 %s1389_s19, 4  ;;  %s1121_s22 = int_to_ptr.vmem [resolvable:$true] %s1120_s22 }
 0x21b   :  { %s1320_s23 = scalar_lea.vmem %s1121_s22, 2048  ;;  %p1325_p9 = scmp.lt.s32.totalorder %s1121_s22, %s1121_s22 }
 0x21c   :  { %p1321_p8 = scmp.ne.s32.totalorder %s1121_s22, %s1320_s23  ;;  %p1326_p10 = scmp.lt.s32.totalorder %s1320_s23, %s1320_s23 }
 0x21e   :  { %p1327_p11 = por %p1326_p10, %p1325_p9 }
 0x220   :  { %p1328_p12 = pnand %p1327_p11, %p1321_p8 }
 0x222   :  { %1331 = shalt.err (!%p1328_p12)
}
 0x223   :  { %1126 = dma.vmem_to_hbm [thread:$0]  %s1121_s22, 2048, %s1965_s8, [#allocation9], %s1387_s11, %s1387_s11, %s1388_s12  }
 0x224   :  { %1344 = dma.done.wait [#allocation7], 2048  }
 0x225   :  { %1345 = vsyncadd [#allocation7], 4294965248 }
 0x226   :  { %1346 = dma.done.wait [#allocation9], 2048  }
 0x227   :  { %1347 = vsyncadd [#allocation9], 4294965248 }
 0x228   :  { %1133 = vsyncpa [#allocation7], 1 }
 0x229   :  { %1134 = vsyncpa [#allocation9], 1 }

</bundles_post_ra>
